<compile_context>
chip_gen: v6e
topology: v6e:2x2x1
jax: 0.10.0
libtpu: 0.0.40
codegen_flags: <defaults>
</compile_context>

<pallas_src>
import math

import jax
import jax.numpy as jnp
from jax import lax
from jax.experimental import pallas as pl
from jax.experimental.pallas import tpu as pltpu

EPS = 1e-6
CHUNK = 8                      # frames per recurrence chunk (one sublane tile)
ROW_ALPHA = CHUNK              # packed-parameter row layout
ROW_DELTA = CHUNK + 1
ROW_ROOT = CHUNK + 2
ROW_DROOT = CHUNK + 3
ROW_S = CHUNK + 4
NPAR = CHUNK + 5               # rows 0..7 = (1-s)^(k+1), rows 8..12 = alpha,delta,root,delta^root,s


def spcen_cc_kernel(x_ref, m0_ref, dct_ref, par_ref,      # inputs
                    out_ref, mlast_ref,                    # outputs
                    m_carry, pcen_buf):                    # scratch
    # x_ref:    (BB, TT, F)   one (batch-block, time-tile) of the spectrogram
    # m0_ref:   (BB, F)       incoming smoother state for this batch block
    # dct_ref:  (F, Cout)     (possibly first-column-dropped) DCT matrix, shared
    # par_ref:  (NPAR, F)     packed per-channel parameters + hoisted constants
    # out_ref:  (BB, TT, Cout) cepstral coefficients for this tile
    # mlast_ref:(BB, F)       outgoing smoother state (written every step, same block)
    # m_carry:  (BB, F) f32   smoother carry across time tiles (VMEM scratch)
    # pcen_buf: (BB, TT, F) f32  PCEN tile feeding the MXU matmul
    BB, TT, F = x_ref.shape
    Cout = out_ref.shape[2]
    n_chunks = TT // CHUNK

    t = pl.program_id(1)

    @pl.when(t == 0)
    def _():
        m_carry[...] = m0_ref[...].astype(jnp.float32)

    par = par_ref[...]                             # (NPAR, F) f32
    dpow = par[0:CHUNK, :]                         # (8, F): (1-s)^(k+1), k=0..7
    d1 = par[0:1, :]                               # (1-s)^1
    d2 = par[1:2, :]                               # (1-s)^2
    d4 = par[3:4, :]                               # (1-s)^4
    alpha = par[ROW_ALPHA:ROW_ALPHA + 1, :]
    delta = par[ROW_DELTA:ROW_DELTA + 1, :]
    root = par[ROW_ROOT:ROW_ROOT + 1, :]
    delta_root = par[ROW_DROOT:ROW_DROOT + 1, :]   # delta**root, hoisted
    s = par[ROW_S:ROW_S + 1, :]

    def chunk_body(c, m_prev):
        x_c = x_ref[:, pl.ds(c * CHUNK, CHUNK), :].astype(jnp.float32)   # (BB, 8, F)

        # Exponentially weighted prefix sum over the 8-frame chunk (sublane axis),
        # log-depth: 3 shift + fma steps instead of an 8-long serial chain.
        #   cum_k = sum_{j<=k} (1-s)^(k-j) * s * x_j
        v = s * x_c
        z = jnp.concatenate(
            [jnp.zeros((BB, 1, F), jnp.float32), v[:, :CHUNK - 1, :]], axis=1)
        v = v + d1 * z
        z = jnp.concatenate(
            [jnp.zeros((BB, 2, F), jnp.float32), v[:, :CHUNK - 2, :]], axis=1)
        v = v + d2 * z
        z = jnp.concatenate(
            [jnp.zeros((BB, 4, F), jnp.float32), v[:, :CHUNK - 4, :]], axis=1)
        v = v + d4 * z
        # M_k = (1-s)^(k+1) * m_prev + cum_k
        m = v + dpow * m_prev[:, None, :]                                 # (BB, 8, F)

        # Fused sPCEN elementwise transform (EUP-bound; delta**root precomputed).
        inv_pow = jnp.exp(-alpha * jnp.log(EPS + m))                      # (EPS+M)^(-alpha)
        pcen = jnp.exp(root * jnp.log(x_c * inv_pow + delta)) - delta_root
        pcen_buf[:, pl.ds(c * CHUNK, CHUNK), :] = pcen

        return m[:, CHUNK - 1, :]

    m_new = lax.fori_loop(0, n_chunks, chunk_body, m_carry[...], unroll=True)
    m_carry[...] = m_new
    mlast_ref[...] = m_new.astype(mlast_ref.dtype)

    # DCT over the whole tile: (BB*TT, F) @ (F, Cout) on the MXU (one call per tile,
    # full M rows; Cout deliberately left un-padded — masked stores are cheaper than
    # 8x the HBM writeback bytes).
    pcen_all = pcen_buf[...].reshape(BB * TT, F)
    cc = jnp.dot(pcen_all, dct_ref[...], preferred_element_type=jnp.float32)
    out_ref[...] = cc.reshape(BB, TT, Cout).astype(out_ref.dtype)


def spcen_cc_frontend(x, m_last_frame, dct, alpha, delta, root, smooth, drop_first=True):
    B, T, F = x.shape
    f32 = jnp.float32

    # Fold drop_first into the DCT matrix: slicing dct is free, slicing the (B, T, C)
    # output in the wrapper would be an extra full HBM round trip.
    dct_used = dct[:, 1:] if drop_first else dct
    Cout = dct_used.shape[1]

    # Pad T to a multiple of CHUNK with zero frames (the smoother just decays through
    # them; the carry is corrected below and padded outputs are sliced off).
    T_pad = -(-T // CHUNK) * CHUNK
    pad = T_pad - T
    if pad:
        x = jnp.pad(x, ((0, 0), (0, pad), (0, 0)))

    # Time tile: a multiple of CHUNK dividing T_pad, capped at 128 frames so long
    # streams keep a bounded VMEM footprint (matters on v7x's 64 MiB) and the x DMAs
    # pipeline against compute.
    TT = math.gcd(T_pad, 128)
    nt = T_pad // TT

    # Batch block: whole B lives in the block so the recurrence runs on (B, F) slabs;
    # split (megacore 'parallel' axis) only when B is large and divisible by 8 so the
    # (BB, F) blocks stay legal w.r.t. the (8, 128) tiling rule.
    BB = B if (B <= 8 or B % 8 != 0) else 8
    nb = B // BB

    # Packed per-channel parameters + hoisted constants: one shared (NPAR, F) input.
    s = smooth.reshape(1, F).astype(f32)
    d = 1.0 - s
    a2 = alpha.reshape(1, F).astype(f32)
    de2 = delta.reshape(1, F).astype(f32)
    r2 = root.reshape(1, F).astype(f32)
    dpow = d ** jnp.arange(1, CHUNK + 1, dtype=f32)[:, None]             # (8, F)
    params = jnp.concatenate([dpow, a2, de2, r2, de2 ** r2, s], axis=0)  # (NPAR, F)

    m0 = m_last_frame.reshape(B, F).astype(f32)

    out_pad, m_last = pl.pallas_call(
        spcen_cc_kernel,
        out_shape=(jax.ShapeDtypeStruct((B, T_pad, Cout), x.dtype),
                   jax.ShapeDtypeStruct((B, F), f32)),
        grid=(nb, nt),
        in_specs=[
            pl.BlockSpec((BB, TT, F), lambda b, t: (b, t, 0)),    # x
            pl.BlockSpec((BB, F), lambda b, t: (b, 0)),           # smoother carry in
            pl.BlockSpec((F, Cout), lambda b, t: (0, 0)),         # dct (shared, constant)
            pl.BlockSpec((NPAR, F), lambda b, t: (0, 0)),         # packed params (shared)
        ],
        out_specs=(
            pl.BlockSpec((BB, TT, Cout), lambda b, t: (b, t, 0)), # cepstral coeffs
            pl.BlockSpec((BB, F), lambda b, t: (b, 0)),           # smoother carry out
        ),
        scratch_shapes=[
            pltpu.VMEM((BB, F), f32),       # smoother carry across time tiles
            pltpu.VMEM((BB, TT, F), f32),   # PCEN tile feeding the DCT matmul
        ],
        compiler_params=pltpu.CompilerParams(
            dimension_semantics=("parallel", "arbitrary")),
    )(x, m0, dct_used.astype(f32), params)

    out = out_pad[:, :T, :] if pad else out_pad
    if pad:
        # Zero padded frames only decay the smoother: undo (1-s)^pad on the carry.
        # TODO(synk): for smooth ~ 1 this correction is ill-conditioned; pass the valid
        # frame count into the kernel instead.
        m_last = m_last * d[0] ** (-float(pad))
    return out, m_last.astype(m_last_frame.dtype)


def ref_forward(x, m_last_frame, dct, alpha, delta, root, smooth, drop_first=True):
    """Pure-JAX reference matching the PyTorch forward semantics."""
    def step(m, xt):
        m_new = (1.0 - smooth) * m + smooth * xt
        return m_new, m_new

    m_final, M = lax.scan(step, m_last_frame, jnp.swapaxes(x, 0, 1))
    M = jnp.swapaxes(M, 0, 1)                                    # (B, T, F)
    pcen = (x / (EPS + M) ** alpha + delta) ** root - delta ** root
    out = pcen @ dct
    if drop_first:
        out = out[..., 1:]
    return out, m_final


if __name__ == "__main__":
    key = jax.random.PRNGKey(0)
    B, T, F, C = 4, 96, 64, 20
    k1, k2 = jax.random.split(key)

    # Non-negative "spectrogram" input and smoother carry state.
    x = jax.random.uniform(k1, (B, T, F), jnp.float32, minval=0.0, maxval=1.0)
    m_last_frame = jax.random.uniform(k2, (B, F), jnp.float32, minval=0.05, maxval=1.0)

    # Deterministic per-channel sPCEN parameters (synthetic, not a checkpoint).
    ch = jnp.arange(F, dtype=jnp.float32)
    alpha = 0.90 + 0.08 * (ch / F)
    delta = 2.0 + 0.5 * (ch / F)
    root = 0.4 + 0.2 * (ch / F)
    smooth = jnp.full((F,), 0.04, jnp.float32)

    # Orthonormal DCT-II matrix, shape (F, C) — the `dct` buffer of the module.
    n = jnp.arange(F, dtype=jnp.float32)[:, None]
    kk = jnp.arange(C, dtype=jnp.float32)[None, :]
    dct = jnp.sqrt(2.0 / F) * jnp.cos(jnp.pi / F * (n + 0.5) * kk)
    dct = dct.at[:, 0].multiply(1.0 / jnp.sqrt(2.0))

    out, m_new = spcen_cc_frontend(x, m_last_frame, dct, alpha, delta, root, smooth,
                                   drop_first=True)
    jax.block_until_ready((out, m_new))

    out_r, m_r = ref_forward(x, m_last_frame, dct, alpha, delta, root, smooth,
                             drop_first=True)
    assert out.shape == (B, T, C - 1), out.shape
    assert m_new.shape == (B, F), m_new.shape
    assert jnp.allclose(out, out_r, rtol=1e-4, atol=1e-4), float(jnp.max(jnp.abs(out - out_r)))
    assert jnp.allclose(m_new, m_r, rtol=1e-4, atol=1e-5), float(jnp.max(jnp.abs(m_new - m_r)))

    print("KERNEL_OK")
</pallas_src>

<mosaic_0001>
module attributes {stable_mosaic.version = 11 : i64} {
  func.func @spcen_cc_kernel(%arg0: i32, %arg1: i32, %arg2: memref<4x32x64xf32, #tpu.memory_space<vmem>>, %arg3: memref<4x64xf32, #tpu.memory_space<vmem>>, %arg4: memref<64x19xf32, #tpu.memory_space<vmem>>, %arg5: memref<13x64xf32, #tpu.memory_space<vmem>>, %arg6: memref<4x32x19xf32, #tpu.memory_space<vmem>>, %arg7: memref<4x64xf32, #tpu.memory_space<vmem>>, %arg8: memref<4x64xf32, #tpu.memory_space<vmem>>, %arg9: memref<4x32x64xf32, #tpu.memory_space<vmem>>) attributes {dimension_semantics = [#tpu.dimension_semantics<parallel>, #tpu.dimension_semantics<arbitrary>], iteration_bounds = array<i64: 1, 3>, scalar_prefetch = 0 : i64, scratch_operands = 2 : i64, tpu.core_type = #tpu.core_type<tc>, window_params = [{transform_indices = @transform_0, window_bounds = array<i64: 4, 32, 64>}, {transform_indices = @transform_1, window_bounds = array<i64: 4, 64>}, {pipeline_mode = #tpu.pipeline_mode<synchronous>, transform_indices = @transform_2, window_bounds = array<i64: 64, 19>}, {pipeline_mode = #tpu.pipeline_mode<synchronous>, transform_indices = @transform_3, window_bounds = array<i64: 13, 64>}, {transform_indices = @transform_4, window_bounds = array<i64: 4, 32, 19>}, {transform_indices = @transform_5, window_bounds = array<i64: 4, 64>}]} {
    %c0_i32 = arith.constant 0 : i32
    %0 = arith.cmpi eq, %arg1, %c0_i32 : i32
    %1 = arith.extui %0 : i1 to i32
    %c0_i32_0 = arith.constant 0 : i32
    %2 = arith.cmpi ne, %1, %c0_i32_0 : i32
    scf.if %2 {
      %c0_60 = arith.constant 0 : index
      %c0_61 = arith.constant 0 : index
      %258 = vector.load %arg3[%c0_60, %c0_61] : memref<4x64xf32, #tpu.memory_space<vmem>>, vector<4x64xf32>
      %c0_62 = arith.constant 0 : index
      %c0_63 = arith.constant 0 : index
      %259 = vector.load %arg8[%c0_62, %c0_63] : memref<4x64xf32, #tpu.memory_space<vmem>>, vector<4x64xf32>
      tpu.vector_store %arg8[%c0_62, %c0_63], %258 {strides = array<i32>} : memref<4x64xf32, #tpu.memory_space<vmem>>, vector<4x64xf32>,
    } else {
    }
    %c0 = arith.constant 0 : index
    %c0_1 = arith.constant 0 : index
    %3 = vector.load %arg5[%c0, %c0_1] : memref<13x64xf32, #tpu.memory_space<vmem>>, vector<13x64xf32>
    %4 = vector.extract_strided_slice %3 {offsets = [0, 0], sizes = [8, 64], strides = [1, 1]} : vector<13x64xf32> to vector<8x64xf32>
    %5 = vector.extract_strided_slice %3 {offsets = [0, 0], sizes = [1, 64], strides = [1, 1]} : vector<13x64xf32> to vector<1x64xf32>
    %6 = vector.extract_strided_slice %3 {offsets = [1, 0], sizes = [1, 64], strides = [1, 1]} : vector<13x64xf32> to vector<1x64xf32>
    %7 = vector.extract_strided_slice %3 {offsets = [3, 0], sizes = [1, 64], strides = [1, 1]} : vector<13x64xf32> to vector<1x64xf32>
    %8 = vector.extract_strided_slice %3 {offsets = [8, 0], sizes = [1, 64], strides = [1, 1]} : vector<13x64xf32> to vector<1x64xf32>
    %9 = vector.extract_strided_slice %3 {offsets = [9, 0], sizes = [1, 64], strides = [1, 1]} : vector<13x64xf32> to vector<1x64xf32>
    %10 = vector.extract_strided_slice %3 {offsets = [10, 0], sizes = [1, 64], strides = [1, 1]} : vector<13x64xf32> to vector<1x64xf32>
    %11 = vector.extract_strided_slice %3 {offsets = [11, 0], sizes = [1, 64], strides = [1, 1]} : vector<13x64xf32> to vector<1x64xf32>
    %12 = vector.extract_strided_slice %3 {offsets = [12, 0], sizes = [1, 64], strides = [1, 1]} : vector<13x64xf32> to vector<1x64xf32>
    %c0_2 = arith.constant 0 : index
    %c0_3 = arith.constant 0 : index
    %13 = vector.load %arg8[%c0_2, %c0_3] : memref<4x64xf32, #tpu.memory_space<vmem>>, vector<4x64xf32>
    %c0_i32_4 = arith.constant 0 : i32
    %c8_i32 = arith.constant 8 : i32
    %14 = arith.muli %c0_i32_4, %c8_i32 : i32
    %c0_5 = arith.constant 0 : index
    %15 = arith.index_cast %14 : i32 to index
    %c0_6 = arith.constant 0 : index
    %16 = vector.load %arg2[%c0_5, %15, %c0_6] : memref<4x32x64xf32, #tpu.memory_space<vmem>>, vector<4x8x64xf32>
    %17 = vector.shape_cast %12 : vector<1x64xf32> to vector<1x1x64xf32>
    %18 = vector.broadcast %17 : vector<1x1x64xf32> to vector<4x8x64xf32>
    %19 = arith.mulf %18, %16 : vector<4x8x64xf32>
    %cst = arith.constant 0.000000e+00 : f32
    %20 = vector.broadcast %cst : f32 to vector<4x1x64xf32>
    %21 = vector.extract_strided_slice %19 {offsets = [0, 0, 0], sizes = [4, 7, 64], strides = [1, 1, 1]} : vector<4x8x64xf32> to vector<4x7x64xf32>
    %22 = tpu.concatenate %20, %21 in 1 : vector<4x1x64xf32>, vector<4x7x64xf32> -> vector<4x8x64xf32>
    %23 = vector.shape_cast %5 : vector<1x64xf32> to vector<1x1x64xf32>
    %24 = vector.broadcast %23 : vector<1x1x64xf32> to vector<4x8x64xf32>
    %25 = arith.mulf %24, %22 : vector<4x8x64xf32>
    %26 = arith.addf %19, %25 : vector<4x8x64xf32>
    %cst_7 = arith.constant 0.000000e+00 : f32
    %27 = vector.broadcast %cst_7 : f32 to vector<4x2x64xf32>
    %28 = vector.extract_strided_slice %26 {offsets = [0, 0, 0], sizes = [4, 6, 64], strides = [1, 1, 1]} : vector<4x8x64xf32> to vector<4x6x64xf32>
    %29 = tpu.concatenate %27, %28 in 1 : vector<4x2x64xf32>, vector<4x6x64xf32> -> vector<4x8x64xf32>
    %30 = vector.shape_cast %6 : vector<1x64xf32> to vector<1x1x64xf32>
    %31 = vector.broadcast %30 : vector<1x1x64xf32> to vector<4x8x64xf32>
    %32 = arith.mulf %31, %29 : vector<4x8x64xf32>
    %33 = arith.addf %26, %32 : vector<4x8x64xf32>
    %cst_8 = arith.constant 0.000000e+00 : f32
    %34 = vector.broadcast %cst_8 : f32 to vector<4x4x64xf32>
    %35 = vector.extract_strided_slice %33 {offsets = [0, 0, 0], sizes = [4, 4, 64], strides = [1, 1, 1]} : vector<4x8x64xf32> to vector<4x4x64xf32>
    %36 = tpu.concatenate %34, %35 in 1 : vector<4x4x64xf32>, vector<4x4x64xf32> -> vector<4x8x64xf32>
    %37 = vector.shape_cast %7 : vector<1x64xf32> to vector<1x1x64xf32>
    %38 = vector.broadcast %37 : vector<1x1x64xf32> to vector<4x8x64xf32>
    %39 = arith.mulf %38, %36 : vector<4x8x64xf32>
    %40 = arith.addf %33, %39 : vector<4x8x64xf32>
    %41 = vector.shape_cast %13 : vector<4x64xf32> to vector<4x1x64xf32>
    %42 = vector.shape_cast %4 : vector<8x64xf32> to vector<1x8x64xf32>
    %43 = vector.broadcast %42 : vector<1x8x64xf32> to vector<4x8x64xf32>
    %44 = vector.broadcast %41 : vector<4x1x64xf32> to vector<4x8x64xf32>
    %45 = arith.mulf %43, %44 : vector<4x8x64xf32>
    %46 = arith.addf %40, %45 : vector<4x8x64xf32>
    %cst_9 = arith.constant 0.000000e+00 : f32
    %47 = vector.broadcast %cst_9 : f32 to vector<1x64xf32>
    %48 = arith.subf %47, %8 : vector<1x64xf32>
    %cst_10 = arith.constant 9.99999997E-7 : f32
    %49 = vector.broadcast %cst_10 : f32 to vector<4x8x64xf32>
    %50 = arith.addf %49, %46 : vector<4x8x64xf32>
    %51 = math.log %50 : vector<4x8x64xf32>
    %52 = vector.shape_cast %48 : vector<1x64xf32> to vector<1x1x64xf32>
    %53 = vector.broadcast %52 : vector<1x1x64xf32> to vector<4x8x64xf32>
    %54 = arith.mulf %53, %51 : vector<4x8x64xf32>
    %55 = math.exp %54 : vector<4x8x64xf32>
    %56 = arith.mulf %16, %55 : vector<4x8x64xf32>
    %57 = vector.shape_cast %9 : vector<1x64xf32> to vector<1x1x64xf32>
    %58 = vector.broadcast %57 : vector<1x1x64xf32> to vector<4x8x64xf32>
    %59 = arith.addf %56, %58 : vector<4x8x64xf32>
    %60 = math.log %59 : vector<4x8x64xf32>
    %61 = vector.shape_cast %10 : vector<1x64xf32> to vector<1x1x64xf32>
    %62 = vector.broadcast %61 : vector<1x1x64xf32> to vector<4x8x64xf32>
    %63 = arith.mulf %62, %60 : vector<4x8x64xf32>
    %64 = math.exp %63 : vector<4x8x64xf32>
    %65 = vector.shape_cast %11 : vector<1x64xf32> to vector<1x1x64xf32>
    %66 = vector.broadcast %65 : vector<1x1x64xf32> to vector<4x8x64xf32>
    %67 = arith.subf %64, %66 : vector<4x8x64xf32>
    %c8_i32_11 = arith.constant 8 : i32
    %68 = arith.muli %c0_i32_4, %c8_i32_11 : i32
    %c0_12 = arith.constant 0 : index
    %69 = arith.index_cast %68 : i32 to index
    %c0_13 = arith.constant 0 : index
    %70 = vector.load %arg9[%c0_12, %69, %c0_13] : memref<4x32x64xf32, #tpu.memory_space<vmem>>, vector<4x8x64xf32>
    tpu.vector_store %arg9[%c0_12, %69, %c0_13], %67 {strides = array<i32>} : memref<4x32x64xf32, #tpu.memory_space<vmem>>, vector<4x8x64xf32>,
    %71 = vector.extract_strided_slice %46 {offsets = [0, 7, 0], sizes = [4, 1, 64], strides = [1, 1, 1]} : vector<4x8x64xf32> to vector<4x1x64xf32>
    %72 = vector.shape_cast %71 : vector<4x1x64xf32> to vector<4x64xf32>
    %c1_i32 = arith.constant 1 : i32
    %c8_i32_14 = arith.constant 8 : i32
    %73 = arith.muli %c1_i32, %c8_i32_14 : i32
    %c0_15 = arith.constant 0 : index
    %74 = arith.index_cast %73 : i32 to index
    %c0_16 = arith.constant 0 : index
    %75 = vector.load %arg2[%c0_15, %74, %c0_16] : memref<4x32x64xf32, #tpu.memory_space<vmem>>, vector<4x8x64xf32>
    %76 = vector.shape_cast %12 : vector<1x64xf32> to vector<1x1x64xf32>
    %77 = vector.broadcast %76 : vector<1x1x64xf32> to vector<4x8x64xf32>
    %78 = arith.mulf %77, %75 : vector<4x8x64xf32>
    %cst_17 = arith.constant 0.000000e+00 : f32
    %79 = vector.broadcast %cst_17 : f32 to vector<4x1x64xf32>
    %80 = vector.extract_strided_slice %78 {offsets = [0, 0, 0], sizes = [4, 7, 64], strides = [1, 1, 1]} : vector<4x8x64xf32> to vector<4x7x64xf32>
    %81 = tpu.concatenate %79, %80 in 1 : vector<4x1x64xf32>, vector<4x7x64xf32> -> vector<4x8x64xf32>
    %82 = vector.shape_cast %5 : vector<1x64xf32> to vector<1x1x64xf32>
    %83 = vector.broadcast %82 : vector<1x1x64xf32> to vector<4x8x64xf32>
    %84 = arith.mulf %83, %81 : vector<4x8x64xf32>
    %85 = arith.addf %78, %84 : vector<4x8x64xf32>
    %cst_18 = arith.constant 0.000000e+00 : f32
    %86 = vector.broadcast %cst_18 : f32 to vector<4x2x64xf32>
    %87 = vector.extract_strided_slice %85 {offsets = [0, 0, 0], sizes = [4, 6, 64], strides = [1, 1, 1]} : vector<4x8x64xf32> to vector<4x6x64xf32>
    %88 = tpu.concatenate %86, %87 in 1 : vector<4x2x64xf32>, vector<4x6x64xf32> -> vector<4x8x64xf32>
    %89 = vector.shape_cast %6 : vector<1x64xf32> to vector<1x1x64xf32>
    %90 = vector.broadcast %89 : vector<1x1x64xf32> to vector<4x8x64xf32>
    %91 = arith.mulf %90, %88 : vector<4x8x64xf32>
    %92 = arith.addf %85, %91 : vector<4x8x64xf32>
    %cst_19 = arith.constant 0.000000e+00 : f32
    %93 = vector.broadcast %cst_19 : f32 to vector<4x4x64xf32>
    %94 = vector.extract_strided_slice %92 {offsets = [0, 0, 0], sizes = [4, 4, 64], strides = [1, 1, 1]} : vector<4x8x64xf32> to vector<4x4x64xf32>
    %95 = tpu.concatenate %93, %94 in 1 : vector<4x4x64xf32>, vector<4x4x64xf32> -> vector<4x8x64xf32>
    %96 = vector.shape_cast %7 : vector<1x64xf32> to vector<1x1x64xf32>
    %97 = vector.broadcast %96 : vector<1x1x64xf32> to vector<4x8x64xf32>
    %98 = arith.mulf %97, %95 : vector<4x8x64xf32>
    %99 = arith.addf %92, %98 : vector<4x8x64xf32>
    %100 = vector.shape_cast %72 : vector<4x64xf32> to vector<4x1x64xf32>
    %101 = vector.shape_cast %4 : vector<8x64xf32> to vector<1x8x64xf32>
    %102 = vector.broadcast %101 : vector<1x8x64xf32> to vector<4x8x64xf32>
    %103 = vector.broadcast %100 : vector<4x1x64xf32> to vector<4x8x64xf32>
    %104 = arith.mulf %102, %103 : vector<4x8x64xf32>
    %105 = arith.addf %99, %104 : vector<4x8x64xf32>
    %cst_20 = arith.constant 0.000000e+00 : f32
    %106 = vector.broadcast %cst_20 : f32 to vector<1x64xf32>
    %107 = arith.subf %106, %8 : vector<1x64xf32>
    %cst_21 = arith.constant 9.99999997E-7 : f32
    %108 = vector.broadcast %cst_21 : f32 to vector<4x8x64xf32>
    %109 = arith.addf %108, %105 : vector<4x8x64xf32>
    %110 = math.log %109 : vector<4x8x64xf32>
    %111 = vector.shape_cast %107 : vector<1x64xf32> to vector<1x1x64xf32>
    %112 = vector.broadcast %111 : vector<1x1x64xf32> to vector<4x8x64xf32>
    %113 = arith.mulf %112, %110 : vector<4x8x64xf32>
    %114 = math.exp %113 : vector<4x8x64xf32>
    %115 = arith.mulf %75, %114 : vector<4x8x64xf32>
    %116 = vector.shape_cast %9 : vector<1x64xf32> to vector<1x1x64xf32>
    %117 = vector.broadcast %116 : vector<1x1x64xf32> to vector<4x8x64xf32>
    %118 = arith.addf %115, %117 : vector<4x8x64xf32>
    %119 = math.log %118 : vector<4x8x64xf32>
    %120 = vector.shape_cast %10 : vector<1x64xf32> to vector<1x1x64xf32>
    %121 = vector.broadcast %120 : vector<1x1x64xf32> to vector<4x8x64xf32>
    %122 = arith.mulf %121, %119 : vector<4x8x64xf32>
    %123 = math.exp %122 : vector<4x8x64xf32>
    %124 = vector.shape_cast %11 : vector<1x64xf32> to vector<1x1x64xf32>
    %125 = vector.broadcast %124 : vector<1x1x64xf32> to vector<4x8x64xf32>
    %126 = arith.subf %123, %125 : vector<4x8x64xf32>
    %c8_i32_22 = arith.constant 8 : i32
    %127 = arith.muli %c1_i32, %c8_i32_22 : i32
    %c0_23 = arith.constant 0 : index
    %128 = arith.index_cast %127 : i32 to index
    %c0_24 = arith.constant 0 : index
    %129 = vector.load %arg9[%c0_23, %128, %c0_24] : memref<4x32x64xf32, #tpu.memory_space<vmem>>, vector<4x8x64xf32>
    tpu.vector_store %arg9[%c0_23, %128, %c0_24], %126 {strides = array<i32>} : memref<4x32x64xf32, #tpu.memory_space<vmem>>, vector<4x8x64xf32>,
    %130 = vector.extract_strided_slice %105 {offsets = [0, 7, 0], sizes = [4, 1, 64], strides = [1, 1, 1]} : vector<4x8x64xf32> to vector<4x1x64xf32>
    %131 = vector.shape_cast %130 : vector<4x1x64xf32> to vector<4x64xf32>
    %c2_i32 = arith.constant 2 : i32
    %c8_i32_25 = arith.constant 8 : i32
    %132 = arith.muli %c2_i32, %c8_i32_25 : i32
    %c0_26 = arith.constant 0 : index
    %133 = arith.index_cast %132 : i32 to index
    %c0_27 = arith.constant 0 : index
    %134 = vector.load %arg2[%c0_26, %133, %c0_27] : memref<4x32x64xf32, #tpu.memory_space<vmem>>, vector<4x8x64xf32>
    %135 = vector.shape_cast %12 : vector<1x64xf32> to vector<1x1x64xf32>
    %136 = vector.broadcast %135 : vector<1x1x64xf32> to vector<4x8x64xf32>
    %137 = arith.mulf %136, %134 : vector<4x8x64xf32>
    %cst_28 = arith.constant 0.000000e+00 : f32
    %138 = vector.broadcast %cst_28 : f32 to vector<4x1x64xf32>
    %139 = vector.extract_strided_slice %137 {offsets = [0, 0, 0], sizes = [4, 7, 64], strides = [1, 1, 1]} : vector<4x8x64xf32> to vector<4x7x64xf32>
    %140 = tpu.concatenate %138, %139 in 1 : vector<4x1x64xf32>, vector<4x7x64xf32> -> vector<4x8x64xf32>
    %141 = vector.shape_cast %5 : vector<1x64xf32> to vector<1x1x64xf32>
    %142 = vector.broadcast %141 : vector<1x1x64xf32> to vector<4x8x64xf32>
    %143 = arith.mulf %142, %140 : vector<4x8x64xf32>
    %144 = arith.addf %137, %143 : vector<4x8x64xf32>
    %cst_29 = arith.constant 0.000000e+00 : f32
    %145 = vector.broadcast %cst_29 : f32 to vector<4x2x64xf32>
    %146 = vector.extract_strided_slice %144 {offsets = [0, 0, 0], sizes = [4, 6, 64], strides = [1, 1, 1]} : vector<4x8x64xf32> to vector<4x6x64xf32>
    %147 = tpu.concatenate %145, %146 in 1 : vector<4x2x64xf32>, vector<4x6x64xf32> -> vector<4x8x64xf32>
    %148 = vector.shape_cast %6 : vector<1x64xf32> to vector<1x1x64xf32>
    %149 = vector.broadcast %148 : vector<1x1x64xf32> to vector<4x8x64xf32>
    %150 = arith.mulf %149, %147 : vector<4x8x64xf32>
    %151 = arith.addf %144, %150 : vector<4x8x64xf32>
    %cst_30 = arith.constant 0.000000e+00 : f32
    %152 = vector.broadcast %cst_30 : f32 to vector<4x4x64xf32>
    %153 = vector.extract_strided_slice %151 {offsets = [0, 0, 0], sizes = [4, 4, 64], strides = [1, 1, 1]} : vector<4x8x64xf32> to vector<4x4x64xf32>
    %154 = tpu.concatenate %152, %153 in 1 : vector<4x4x64xf32>, vector<4x4x64xf32> -> vector<4x8x64xf32>
    %155 = vector.shape_cast %7 : vector<1x64xf32> to vector<1x1x64xf32>
    %156 = vector.broadcast %155 : vector<1x1x64xf32> to vector<4x8x64xf32>
    %157 = arith.mulf %156, %154 : vector<4x8x64xf32>
    %158 = arith.addf %151, %157 : vector<4x8x64xf32>
    %159 = vector.shape_cast %131 : vector<4x64xf32> to vector<4x1x64xf32>
    %160 = vector.shape_cast %4 : vector<8x64xf32> to vector<1x8x64xf32>
    %161 = vector.broadcast %160 : vector<1x8x64xf32> to vector<4x8x64xf32>
    %162 = vector.broadcast %159 : vector<4x1x64xf32> to vector<4x8x64xf32>
    %163 = arith.mulf %161, %162 : vector<4x8x64xf32>
    %164 = arith.addf %158, %163 : vector<4x8x64xf32>
    %cst_31 = arith.constant 0.000000e+00 : f32
    %165 = vector.broadcast %cst_31 : f32 to vector<1x64xf32>
    %166 = arith.subf %165, %8 : vector<1x64xf32>
    %cst_32 = arith.constant 9.99999997E-7 : f32
    %167 = vector.broadcast %cst_32 : f32 to vector<4x8x64xf32>
    %168 = arith.addf %167, %164 : vector<4x8x64xf32>
    %169 = math.log %168 : vector<4x8x64xf32>
    %170 = vector.shape_cast %166 : vector<1x64xf32> to vector<1x1x64xf32>
    %171 = vector.broadcast %170 : vector<1x1x64xf32> to vector<4x8x64xf32>
    %172 = arith.mulf %171, %169 : vector<4x8x64xf32>
    %173 = math.exp %172 : vector<4x8x64xf32>
    %174 = arith.mulf %134, %173 : vector<4x8x64xf32>
    %175 = vector.shape_cast %9 : vector<1x64xf32> to vector<1x1x64xf32>
    %176 = vector.broadcast %175 : vector<1x1x64xf32> to vector<4x8x64xf32>
    %177 = arith.addf %174, %176 : vector<4x8x64xf32>
    %178 = math.log %177 : vector<4x8x64xf32>
    %179 = vector.shape_cast %10 : vector<1x64xf32> to vector<1x1x64xf32>
    %180 = vector.broadcast %179 : vector<1x1x64xf32> to vector<4x8x64xf32>
    %181 = arith.mulf %180, %178 : vector<4x8x64xf32>
    %182 = math.exp %181 : vector<4x8x64xf32>
    %183 = vector.shape_cast %11 : vector<1x64xf32> to vector<1x1x64xf32>
    %184 = vector.broadcast %183 : vector<1x1x64xf32> to vector<4x8x64xf32>
    %185 = arith.subf %182, %184 : vector<4x8x64xf32>
    %c8_i32_33 = arith.constant 8 : i32
    %186 = arith.muli %c2_i32, %c8_i32_33 : i32
    %c0_34 = arith.constant 0 : index
    %187 = arith.index_cast %186 : i32 to index
    %c0_35 = arith.constant 0 : index
    %188 = vector.load %arg9[%c0_34, %187, %c0_35] : memref<4x32x64xf32, #tpu.memory_space<vmem>>, vector<4x8x64xf32>
    tpu.vector_store %arg9[%c0_34, %187, %c0_35], %185 {strides = array<i32>} : memref<4x32x64xf32, #tpu.memory_space<vmem>>, vector<4x8x64xf32>,
    %189 = vector.extract_strided_slice %164 {offsets = [0, 7, 0], sizes = [4, 1, 64], strides = [1, 1, 1]} : vector<4x8x64xf32> to vector<4x1x64xf32>
    %190 = vector.shape_cast %189 : vector<4x1x64xf32> to vector<4x64xf32>
    %c3_i32 = arith.constant 3 : i32
    %c8_i32_36 = arith.constant 8 : i32
    %191 = arith.muli %c3_i32, %c8_i32_36 : i32
    %c0_37 = arith.constant 0 : index
    %192 = arith.index_cast %191 : i32 to index
    %c0_38 = arith.constant 0 : index
    %193 = vector.load %arg2[%c0_37, %192, %c0_38] : memref<4x32x64xf32, #tpu.memory_space<vmem>>, vector<4x8x64xf32>
    %194 = vector.shape_cast %12 : vector<1x64xf32> to vector<1x1x64xf32>
    %195 = vector.broadcast %194 : vector<1x1x64xf32> to vector<4x8x64xf32>
    %196 = arith.mulf %195, %193 : vector<4x8x64xf32>
    %cst_39 = arith.constant 0.000000e+00 : f32
    %197 = vector.broadcast %cst_39 : f32 to vector<4x1x64xf32>
    %198 = vector.extract_strided_slice %196 {offsets = [0, 0, 0], sizes = [4, 7, 64], strides = [1, 1, 1]} : vector<4x8x64xf32> to vector<4x7x64xf32>
    %199 = tpu.concatenate %197, %198 in 1 : vector<4x1x64xf32>, vector<4x7x64xf32> -> vector<4x8x64xf32>
    %200 = vector.shape_cast %5 : vector<1x64xf32> to vector<1x1x64xf32>
    %201 = vector.broadcast %200 : vector<1x1x64xf32> to vector<4x8x64xf32>
    %202 = arith.mulf %201, %199 : vector<4x8x64xf32>
    %203 = arith.addf %196, %202 : vector<4x8x64xf32>
    %cst_40 = arith.constant 0.000000e+00 : f32
    %204 = vector.broadcast %cst_40 : f32 to vector<4x2x64xf32>
    %205 = vector.extract_strided_slice %203 {offsets = [0, 0, 0], sizes = [4, 6, 64], strides = [1, 1, 1]} : vector<4x8x64xf32> to vector<4x6x64xf32>
    %206 = tpu.concatenate %204, %205 in 1 : vector<4x2x64xf32>, vector<4x6x64xf32> -> vector<4x8x64xf32>
    %207 = vector.shape_cast %6 : vector<1x64xf32> to vector<1x1x64xf32>
    %208 = vector.broadcast %207 : vector<1x1x64xf32> to vector<4x8x64xf32>
    %209 = arith.mulf %208, %206 : vector<4x8x64xf32>
    %210 = arith.addf %203, %209 : vector<4x8x64xf32>
    %cst_41 = arith.constant 0.000000e+00 : f32
    %211 = vector.broadcast %cst_41 : f32 to vector<4x4x64xf32>
    %212 = vector.extract_strided_slice %210 {offsets = [0, 0, 0], sizes = [4, 4, 64], strides = [1, 1, 1]} : vector<4x8x64xf32> to vector<4x4x64xf32>
    %213 = tpu.concatenate %211, %212 in 1 : vector<4x4x64xf32>, vector<4x4x64xf32> -> vector<4x8x64xf32>
    %214 = vector.shape_cast %7 : vector<1x64xf32> to vector<1x1x64xf32>
    %215 = vector.broadcast %214 : vector<1x1x64xf32> to vector<4x8x64xf32>
    %216 = arith.mulf %215, %213 : vector<4x8x64xf32>
    %217 = arith.addf %210, %216 : vector<4x8x64xf32>
    %218 = vector.shape_cast %190 : vector<4x64xf32> to vector<4x1x64xf32>
    %219 = vector.shape_cast %4 : vector<8x64xf32> to vector<1x8x64xf32>
    %220 = vector.broadcast %219 : vector<1x8x64xf32> to vector<4x8x64xf32>
    %221 = vector.broadcast %218 : vector<4x1x64xf32> to vector<4x8x64xf32>
    %222 = arith.mulf %220, %221 : vector<4x8x64xf32>
    %223 = arith.addf %217, %222 : vector<4x8x64xf32>
    %cst_42 = arith.constant 0.000000e+00 : f32
    %224 = vector.broadcast %cst_42 : f32 to vector<1x64xf32>
    %225 = arith.subf %224, %8 : vector<1x64xf32>
    %cst_43 = arith.constant 9.99999997E-7 : f32
    %226 = vector.broadcast %cst_43 : f32 to vector<4x8x64xf32>
    %227 = arith.addf %226, %223 : vector<4x8x64xf32>
    %228 = math.log %227 : vector<4x8x64xf32>
    %229 = vector.shape_cast %225 : vector<1x64xf32> to vector<1x1x64xf32>
    %230 = vector.broadcast %229 : vector<1x1x64xf32> to vector<4x8x64xf32>
    %231 = arith.mulf %230, %228 : vector<4x8x64xf32>
    %232 = math.exp %231 : vector<4x8x64xf32>
    %233 = arith.mulf %193, %232 : vector<4x8x64xf32>
    %234 = vector.shape_cast %9 : vector<1x64xf32> to vector<1x1x64xf32>
    %235 = vector.broadcast %234 : vector<1x1x64xf32> to vector<4x8x64xf32>
    %236 = arith.addf %233, %235 : vector<4x8x64xf32>
    %237 = math.log %236 : vector<4x8x64xf32>
    %238 = vector.shape_cast %10 : vector<1x64xf32> to vector<1x1x64xf32>
    %239 = vector.broadcast %238 : vector<1x1x64xf32> to vector<4x8x64xf32>
    %240 = arith.mulf %239, %237 : vector<4x8x64xf32>
    %241 = math.exp %240 : vector<4x8x64xf32>
    %242 = vector.shape_cast %11 : vector<1x64xf32> to vector<1x1x64xf32>
    %243 = vector.broadcast %242 : vector<1x1x64xf32> to vector<4x8x64xf32>
    %244 = arith.subf %241, %243 : vector<4x8x64xf32>
    %c8_i32_44 = arith.constant 8 : i32
    %245 = arith.muli %c3_i32, %c8_i32_44 : i32
    %c0_45 = arith.constant 0 : index
    %246 = arith.index_cast %245 : i32 to index
    %c0_46 = arith.constant 0 : index
    %247 = vector.load %arg9[%c0_45, %246, %c0_46] : memref<4x32x64xf32, #tpu.memory_space<vmem>>, vector<4x8x64xf32>
    tpu.vector_store %arg9[%c0_45, %246, %c0_46], %244 {strides = array<i32>} : memref<4x32x64xf32, #tpu.memory_space<vmem>>, vector<4x8x64xf32>,
    %248 = vector.extract_strided_slice %223 {offsets = [0, 7, 0], sizes = [4, 1, 64], strides = [1, 1, 1]} : vector<4x8x64xf32> to vector<4x1x64xf32>
    %249 = vector.shape_cast %248 : vector<4x1x64xf32> to vector<4x64xf32>
    %c4_i32 = arith.constant 4 : i32
    %c0_47 = arith.constant 0 : index
    %c0_48 = arith.constant 0 : index
    %250 = vector.load %arg8[%c0_47, %c0_48] : memref<4x64xf32, #tpu.memory_space<vmem>>, vector<4x64xf32>
    tpu.vector_store %arg8[%c0_47, %c0_48], %249 {strides = array<i32>} : memref<4x64xf32, #tpu.memory_space<vmem>>, vector<4x64xf32>,
    %c0_49 = arith.constant 0 : index
    %c0_50 = arith.constant 0 : index
    %251 = vector.load %arg7[%c0_49, %c0_50] : memref<4x64xf32, #tpu.memory_space<vmem>>, vector<4x64xf32>
    tpu.vector_store %arg7[%c0_49, %c0_50], %249 {strides = array<i32>} : memref<4x64xf32, #tpu.memory_space<vmem>>, vector<4x64xf32>,
    %c0_51 = arith.constant 0 : index
    %c0_52 = arith.constant 0 : index
    %c0_53 = arith.constant 0 : index
    %252 = vector.load %arg9[%c0_51, %c0_52, %c0_53] : memref<4x32x64xf32, #tpu.memory_space<vmem>>, vector<4x32x64xf32>
    %253 = vector.shape_cast %252 : vector<4x32x64xf32> to vector<128x64xf32>
    %c0_54 = arith.constant 0 : index
    %c0_55 = arith.constant 0 : index
    %254 = vector.load %arg4[%c0_54, %c0_55] : memref<64x19xf32, #tpu.memory_space<vmem>>, vector<64x19xf32>
    %cst_56 = arith.constant dense<0.000000e+00> : vector<128x19xf32>
    %255 = tpu.matmul %253, %254, %cst_56 {dimension_numbers = #tpu.dot_dimension_numbers<[1], [0], [0], [1], [0, 0, 1, 1], [], []>} : vector<128x64xf32>, vector<64x19xf32>, vector<128x19xf32> -> vector<128x19xf32>
    %256 = vector.shape_cast %255 : vector<128x19xf32> to vector<4x32x19xf32>
    %c0_57 = arith.constant 0 : index
    %c0_58 = arith.constant 0 : index
    %c0_59 = arith.constant 0 : index
    %257 = vector.load %arg6[%c0_57, %c0_58, %c0_59] : memref<4x32x19xf32, #tpu.memory_space<vmem>>, vector<4x32x19xf32>
    tpu.vector_store %arg6[%c0_57, %c0_58, %c0_59], %256 {strides = array<i32>} : memref<4x32x19xf32, #tpu.memory_space<vmem>>, vector<4x32x19xf32>,
    return
  }
  func.func @transform_0(%arg0: i32, %arg1: i32) -> (i32, i32, i32) {
    %c0_i32 = arith.constant 0 : i32
    %c0_i32_0 = arith.constant 0 : i32
    return %arg0, %arg1, %c0_i32 : i32, i32, i32
  }
  func.func @transform_1(%arg0: i32, %arg1: i32) -> (i32, i32) {
    %c0_i32 = arith.constant 0 : i32
    %c0_i32_0 = arith.constant 0 : i32
    return %arg0, %c0_i32 : i32, i32
  }
  func.func @transform_2(%arg0: i32, %arg1: i32) -> (i32, i32) {
    %c0_i32 = arith.constant 0 : i32
    %c0_i32_0 = arith.constant 0 : i32
    %c0_i32_1 = arith.constant 0 : i32
    return %c0_i32, %c0_i32_0 : i32, i32
  }
  func.func @transform_3(%arg0: i32, %arg1: i32) -> (i32, i32) {
    %c0_i32 = arith.constant 0 : i32
    %c0_i32_0 = arith.constant 0 : i32
    %c0_i32_1 = arith.constant 0 : i32
    return %c0_i32, %c0_i32_0 : i32, i32
  }
  func.func @transform_4(%arg0: i32, %arg1: i32) -> (i32, i32, i32) {
    %c0_i32 = arith.constant 0 : i32
    %c0_i32_0 = arith.constant 0 : i32
    return %arg0, %arg1, %c0_i32 : i32, i32, i32
  }
  func.func @transform_5(%arg0: i32, %arg1: i32) -> (i32, i32) {
    %c0_i32 = arith.constant 0 : i32
    %c0_i32_0 = arith.constant 0 : i32
    return %arg0, %c0_i32 : i32, i32
  }
}

</mosaic_0001>

<bundles_post_ra>
// kernel: tpu_custom_call.1
= control target key start
LH: loop header
LB: loop body
LE: loop exit
PB: predicated region body
PF: predicated region fallthrough
CT: control target
= control target key end

     0   :  { %11 = vsyncpa [#allocation7], 0  ;;  %s1958_s18 = smov 0   ;;  %s1960_s19 = smov 0   ;;  %s2557_s0 = inlined_call_operand.vmem [shape: f32[4,96,64], index: 0, kind: input, shape index: {}]   ;;  %s2558_s1 = inlined_call_operand.vmem [shape: f32[4,64], index: 1, kind: input, shape index: {}]   ;;  %s2559_s2 = inlined_call_operand.vmem [shape: f32[64,19], index: 2, kind: input, shape index: {}]   ;;  %s2560_s3 = inlined_call_operand.vmem [shape: f32[13,64], index: 3, kind: input, shape index: {}]   ;;  %s2561_s4 = inlined_call_operand.vmem [shape: f32[4,96,19], index: 4, kind: output, shape index: {0}]   ;;  %s2562_s5 = inlined_call_operand.hbm [shape: f32[4,64], index: 5, kind: output, shape index: {1}]  }
   0x1   :  { %s1962_s20 = smov 0   ;;  %s1964_s21 = smov 0  }
   0x2   :  { %s1966_s22 = smov 0  }
   0x3 LB: > { %s26_s23 = sadd.s32 1, %s1920_s21  ;;  %s1564_s24 = sadd.s32 4294967295, %s1924_s22   ;;  %s1924_s22 = sphi %s1966_s22, %s17_s22   ;;  %s1920_s21 = sphi %s1964_s21, %s2568_s21   ;;  %s1916_s20 = sphi %s1962_s20, %s2567_s20   ;;  %s1912_s19 = sphi %s1960_s19, %s2566_s19   ;;  %s1908_s18 = sphi %s1958_s18, %s2565_s18  }
   0x4   : > { %p27_p0 = scmp.ge.s32.totalorder %s26_s23, 3  ;;  %p45_p1 = scmp.ne.s32.totalorder %s1912_s19, %s1908_s18 }
   0x5   : > { %p46_p2 = scmp.eq.s32.totalorder %s1924_s22, 0  ;;  %p1990_p4 = scmp.eq.s32.totalorder %s1564_s24, 2 }
   0x6   : > { %s2570_s23 = smov (%p27_p0, %s26_s23), 0  ;;  %s38_s27 = sadd.s32 1, %s1912_s19 }
   0x7   : > { %p47_p3 = por %p46_p2, %p45_p1  ;;  %s34_s26 = ssub.s32 %s1920_s21, %s2570_s23 }
   0x8   : > { %p36_p5 = scmp.eq.s32.totalorder %s34_s26, 0  ;;  %p1999_p6 = por %p1990_p4, %p45_p1 }
   0x9   : > { %p1568_p7 = scmp.ge.s32.totalorder %s1924_s22, 3 }
   0xa   : > { %s2004_s29 = scalar_select %p36_p5, %s1912_s19, %s38_s27  }
   0xb   : > { %206 = sbr.rel (%p1568_p7) target bundleno = 28 (0x1c), region = 28 }
  0x10   : > { %209 = sbr.rel (!%p47_p3) target bundleno = 28 (0x1c), region = 32  ;;  %s211_s30 = sand.u32 (%p47_p3), 1, %s1912_s19  }
  0x11   : > { %s1600_s6 = sshll.u32 (%p47_p3), %s1920_s21, 5  ;;  %s1569_s7 = sshll.u32 (%p47_p3), %s211_s30, 7 }
  0x12   : > { %s2012_s10 = scalar_lea.vmem (%p47_p3), %s2557_s0, %s1600_s6  ;;  %s213_s11 = scalar_lea.vmem (%p47_p3), [#allocation4], %s1569_s7 }
  0x13   : > { %v278_v0 = vld [vmem:[%s2012_s10] sm:$0xff] (%p47_p3)  ;;  %v280_v1 = vld [vmem:[%s2012_s10 + $0x8] sm:$0xff] (%p47_p3)  ;;  %v282_v2 = vld [vmem:[%s2012_s10 + $0x10] sm:$0xff] (%p47_p3) }
  0x14   : > { %279 = vst [vmem:[%s213_s11] sm:$0xff] (%p47_p3), %v278_v0  ;;  %281 = vst [vmem:[%s213_s11 + $0x8] sm:$0xff] (%p47_p3), %v280_v1  ;;  %v284_v3 = vld [vmem:[%s2012_s10 + $0x18] sm:$0xff] (%p47_p3)  ;;  %v286_v4 = vld [vmem:[%s2012_s10 + $0x60] sm:$0xff] (%p47_p3) }
  0x15   : > { %283 = vst [vmem:[%s213_s11 + $0x10] sm:$0xff] %v282_v2  ;;  %v288_v5 = vld [vmem:[%s2012_s10 + $0x68] sm:$0xff]  ;;  %285 = vst [vmem:[%s213_s11 + $0x18] sm:$0xff] %v284_v3  ;;  %v290_v6 = vld [vmem:[%s2012_s10 + $0x70] sm:$0xff] }
  0x16   : > { %287 = vst [vmem:[%s213_s11 + $0x20] sm:$0xff] %v286_v4  ;;  %289 = vst [vmem:[%s213_s11 + $0x28] sm:$0xff] %v288_v5  ;;  %v292_v7 = vld [vmem:[%s2012_s10 + $0x78] sm:$0xff]  ;;  %v294_v8 = vld [vmem:[%s2012_s10 + $0xc0] sm:$0xff] }
  0x17   : > { %291 = vst [vmem:[%s213_s11 + $0x30] sm:$0xff] %v290_v6  ;;  %293 = vst [vmem:[%s213_s11 + $0x38] sm:$0xff] %v292_v7  ;;  %v296_v9 = vld [vmem:[%s2012_s10 + $0xc8] sm:$0xff]  ;;  %v298_v10 = vld [vmem:[%s2012_s10 + $0xd0] sm:$0xff] }
  0x18   : > { %295 = vst [vmem:[%s213_s11 + $0x40] sm:$0xff] %v294_v8  ;;  %v300_v11 = vld [vmem:[%s2012_s10 + $0xd8] sm:$0xff]  ;;  %297 = vst [vmem:[%s213_s11 + $0x48] sm:$0xff] %v296_v9  ;;  %v302_v12 = vld [vmem:[%s2012_s10 + $0x120] sm:$0xff] }
  0x19   : > { %299 = vst [vmem:[%s213_s11 + $0x50] sm:$0xff] %v298_v10  ;;  %301 = vst [vmem:[%s213_s11 + $0x58] sm:$0xff] %v300_v11  ;;  %v304_v13 = vld [vmem:[%s2012_s10 + $0x128] sm:$0xff]  ;;  %v306_v14 = vld [vmem:[%s2012_s10 + $0x130] sm:$0xff] }
  0x1a   : > { %303 = vst [vmem:[%s213_s11 + $0x60] sm:$0xff] %v302_v12  ;;  %305 = vst [vmem:[%s213_s11 + $0x68] sm:$0xff] %v304_v13  ;;  %v308_v15 = vld [vmem:[%s2012_s10 + $0x138] sm:$0xff] }
  0x1b   : > { %307 = vst [vmem:[%s213_s11 + $0x70] sm:$0xff] %v306_v14  ;;  %309 = vst [vmem:[%s213_s11 + $0x78] sm:$0xff] %v308_v15 }
  0x1c PF: > { %p1572_p8 = scmp.ge.s32.totalorder %s1924_s22, 1  ;;  %p314_p9 = scmp.lt.s32.totalorder %s1924_s22, 4 }
  0x1e   : > { %p315_p10 = pnand %p1572_p8, %p314_p9 }
  0x1f   : > { %s321_s12 = sand.u32 (!%p315_p10), 1, %s1908_s18   ;;  %p1575_p11 = scmp.ne.s32.totalorder (!%p315_p10), %s1916_s20, 0 }
  0x20   : > { %318 = sbr.rel (%p315_p10) target bundleno = 466 (0x1d2), region = 70  ;;  %s1573_s13 = sshll.u32 (!%p315_p10), %s321_s12, 7 }
  0x21   : > { %s2033_s14 = scalar_lea.vmem (!%p315_p10), [#allocation4], %s1573_s13  ;;  %s2035_s15 = scalar_lea.vmem (!%p315_p10), [#allocation5], %s1573_s13 }
  0x25   : > { %362 = sbr.rel (%p1575_p11) target bundleno = 44 (0x2c), region = 78 }
  0x2a   : > { %v363_v16 = vld [vmem:[%s2558_s1] sm:$0xf]  ;;  %vm364_vm0 = vcmask 519168  }
  0x2b   : > { %365 = vst.msk [vmem:[#allocation2] sm:$0xf] %vm364_vm0, %v363_v16 }
  0x2c PF: > { %v1133_v17 = vld [vmem:[%s2559_s2 + $0x38] sm:$0xff]  ;;  %v1132_v18 = vld [vmem:[%s2559_s2 + $0x30] sm:$0xff]  ;;  %v373_v19 = vlaneseq  ;;  %v1131_v20 = vld [vmem:[%s2559_s2 + $0x28] sm:$0xff]  ;;  %v1926_v22 = vmov 1966171168   ;;  %vm393_vm1 = vcmask 1040384  }
  0x2d   : > { %1626 = vmatprep.subr.mxu0 %v1133_v17  ;;  %1666 = vmatprep.subr.mxu1 %v1133_v17  ;;  %v478_v23 = vunpack.c.l.s4 %v1926_v22  ;;  %v2055_v24 = vld [vmem:[%s2560_s3 + $0x8] sm:$0x1f]  ;;  %v1130_v25 = vld [vmem:[%s2559_s2 + $0x20] sm:$0xff]  ;;  %v1129_v34 = vld [vmem:[%s2559_s2 + $0x18] sm:$0xff]  ;;  %vm422_vm2 = vcmask 1041408   ;;  %vm451_vm3 = vcmask 1043456  }
  0x2e   : > { %1627 = vmatpush3.msra.mxu0 %v1133_v17  ;;  %1674 = vmatpush3.msra.mxu1 %v1133_v17  ;;  %v2050_v21 = vshrl.u32 %v373_v19, 7  ;;  %v2063_v26 = vld [vmem:[%s2560_s3] sm:$0xff]  ;;  %v2099_v41 = vld [vmem:[%s2033_s14 + $0x8] sm:$0xff]  ;;  %v2105_v43 = vld [vmem:[%s2033_s14 + $0x10] sm:$0xff]  ;;  %v521_v50 = vsub.f32 0.0, %v2055_v24  ;;  %vm1104_vm4 = vcmask 523271  }
  0x2f   : > { %1628 = vmatprep.subr.mxu0 %v1132_v18  ;;  %1667 = vmatprep.subr.mxu1 %v1132_v18  ;;  %v2072_v31 = vld [vmem:[%s2033_s14] sm:$0xff]  ;;  %v479_v32 = vunpack.c.0.s8 %v478_v23  ;;  %v2102_v42 = vld [vmem:[%s2033_s14 + $0x48] sm:$0xff]  ;;  %v2119_v48 = vld [vmem:[%s2033_s14 + $0x50] sm:$0xff]  ;;  %vm594_vm5 = vcmask 523264   ;;  %vm1097_vm6 = vcmask 1041409   ;;  %vm1100_vm7 = vcmask 1042434  }
  0x30   : > { %1629 = vmatpush3.msra.mxu0 %v1132_v18  ;;  %1675 = vmatpush3.msra.mxu1 %v1132_v18  ;;  %v375_v27 = vsub.s32 4, %v2050_v21  ;;  %v2067_v28 = vsub.s32 0, %v2050_v21  ;;  %v429_v29 = vsub.s32 1, %v2050_v21  ;;  %v458_v30 = vsub.s32 3, %v2050_v21  ;;  %v2084_v37 = vld [vmem:[%s2033_s14 + $0x40] sm:$0xff]  ;;  %v1128_v44 = vld [vmem:[%s2559_s2 + $0x10] sm:$0xff] }
  0x31   : > { %1630 = vmatprep.subr.mxu0 %v1131_v20  ;;  %1668 = vmatprep.subr.mxu1 %v1131_v20  ;;  %v572_v33 = vsub.s32 2, %v2050_v21  ;;  %v2096_v40 = vsub.s32 %v479_v32, %v2050_v21  ;;  %v1127_v53 = vld [vmem:[%s2559_s2 + $0x8] sm:$0xff]  ;;  %v1126_v62 = vld [vmem:[%s2559_s2] sm:$0xff]  ;;  %v2163_v16 = vsub.s32 7, %v2050_v21  ;;  %vm1106_vm8 = vcmask 518144  }
  0x32   : > { %1631 = vmatpush3.msra.mxu0 %v1131_v20  ;;  %1676 = vmatpush3.msra.mxu1 %v1131_v20  ;;  %v2078_v35 = vld.sshfl [vmem:[#allocation2] sm:$0x33 pattern:$0x75316420]  ;;  %v2081_v36 = vrot.slane %v2055_v24, %v375_v27  ;;  %v2088_v38 = vrot.slane %v2063_v26, %v2067_v28  ;;  %v2093_v39 = vrot.slane %v2063_v26, %v429_v29  ;;  %vm1327_vm9 = vcmask 154624  }
  0x33   : > { %1632 = vmatprep.subr.mxu0 %v1130_v25  ;;  %1669 = vmatprep.subr.mxu1 %v1130_v25  ;;  %v2113_v46 = vrot.slane %v2063_v26, %v458_v30  ;;  %v2116_v47 = vrot.slane %v2055_v24, %v572_v33  ;;  %v483_v49 = vrot.slane %v2078_v35, %v2096_v40  ;;  %v2156_v11 = vld [vmem:[%s2033_s14 + $0x18] sm:$0xff] }
  0x34   : > { %1633 = vmatpush3.msra.mxu0 %v1130_v25  ;;  %1677 = vmatpush3.msra.mxu1 %v1130_v25  ;;  %v377_v45 = vmul.f32 %v2081_v36, %v2072_v31  ;;  %v2125_v51 = vrot.slane %v2055_v24, %v458_v30  ;;  %v379_v52 = vmul.f32 %v2081_v36, %v2084_v37  ;;  %v2168_v20 = vld [vmem:[%s2033_s14 + $0x58] sm:$0xff] }
  0x35   : > { %1634 = vmatprep.subr.mxu0 %v1129_v34  ;;  %1670 = vmatprep.subr.mxu1 %v1129_v34  ;;  %v603_v55 = vmul.f32 %v2099_v41, %v2081_v36  ;;  %v605_v56 = vmul.f32 %v2102_v42, %v2081_v36  ;;  %v767_v57 = vmul.f32 %v2105_v43, %v2081_v36 }
  0x36   : > { %1635 = vmatpush3.msra.mxu0 %v1129_v34  ;;  %1678 = vmatpush3.msra.mxu1 %v1129_v34  ;;  %v385_v54 = vrot.slane %v377_v45, 7  ;;  %v496_v58 = vrot.slane %v483_v49, %v2067_v28  ;;  %v387_v59 = vrot.slane %v379_v52, 7  ;;  %v491_v60 = vcombine.high %v483_v49, %v483_v49 }
  0x37   : > { %1636 = vmatprep.subr.mxu0 %v1128_v44  ;;  %1671 = vmatprep.subr.mxu1 %v1128_v44  ;;  %v769_v61 = vmul.f32 %v2119_v48, %v2081_v36  ;;  %v611_v0 = vrot.slane %v603_v55, 7  ;;  %v613_v1 = vrot.slane %v605_v56, 7  ;;  %v775_v2 = vrot.slane %v767_v57, 7 }
  0x38   : > { %1637 = vmatpush3.msra.mxu0 %v1128_v44  ;;  %1679 = vmatpush3.msra.mxu1 %v1128_v44  ;;  %v394_v63 = vsel %vm393_vm1, 0.0, %v385_v54  ;;  %v2147_v4 = vmul.f32 %v496_v58, %v2063_v26  ;;  %v396_v5 = vsel %vm393_vm1, 0.0, %v387_v59  ;;  %v504_v6 = vrot.slane %v491_v60, %v2067_v28 }
  0x39   : > { %1638 = vmatprep.subr.mxu0 %v1127_v53  ;;  %1672 = vmatprep.subr.mxu1 %v1127_v53  ;;  %v402_v3 = vmul.f32 %v2088_v38, %v394_v63  ;;  %v404_v7 = vmul.f32 %v2088_v38, %v396_v5  ;;  %v619_v8 = vsel %vm393_vm1, 0.0, %v611_v0  ;;  %v621_v9 = vsel %vm393_vm1, 0.0, %v613_v1 }
  0x3a   : > { %1639 = vmatpush3.msra.mxu0 %v1127_v53  ;;  %1680 = vmatpush3.msra.mxu1 %v1127_v53  ;;  %v783_v10 = vsel %vm393_vm1, 0.0, %v775_v2  ;;  %v2159_v13 = vmul.f32 %v504_v6, %v2063_v26  ;;  %v623_v14 = vmul.f32 %v619_v8, %v2088_v38  ;;  %v777_v15 = vrot.slane %v769_v61, 7 }
  0x3b   : > { %1640 = vmatprep.subr.mxu0 %v1126_v62  ;;  %1673 = vmatprep.subr.mxu1 %v1126_v62  ;;  %v406_v12 = vadd.f32 %v402_v3, %v377_v45  ;;  %v408_v17 = vadd.f32 %v404_v7, %v379_v52  ;;  %v625_v18 = vmul.f32 %v621_v9, %v2088_v38 }
  0x3c   : > { %1641 = vmatpush3.msra.mxu0 %v1126_v62  ;;  %1681 = vmatpush3.msra.mxu1 %v1126_v62  ;;  %v787_v19 = vmul.f32 %v783_v10, %v2088_v38  ;;  %v627_v23 = vadd.f32 %v623_v14, %v603_v55  ;;  %v785_v25 = vsel %vm393_vm1, 0.0, %v777_v15  ;;  %v931_v27 = vmul.f32 %v2156_v11, %v2081_v36 }
  0x3d   : > { %v414_v22 = vrot.slane %v406_v12, 6  ;;  %v416_v30 = vrot.slane %v408_v17, 6  ;;  %v629_v32 = vadd.f32 %v625_v18, %v605_v56  ;;  %v789_v34 = vmul.f32 %v785_v25, %v2088_v38 }
  0x3e   : > { %v791_v33 = vadd.f32 %v787_v19, %v767_v57  ;;  %v635_v45 = vrot.slane %v627_v23, 6  ;;  %v939_v49 = vrot.slane %v931_v27, 7  ;;  %v2177_v52 = vmul.f32 %v2168_v20, %v2081_v36 }
  0x3f   : > { %v423_v44 = vsel %vm422_vm2, 0.0, %v414_v22  ;;  %v425_v54 = vsel %vm422_vm2, 0.0, %v416_v30  ;;  %v637_v55 = vrot.slane %v629_v32, 6  ;;  %v793_v57 = vadd.f32 %v789_v34, %v769_v61 }
  0x40   : > { %v431_v53 = vmul.f32 %v2093_v39, %v423_v44  ;;  %v799_v58 = vrot.slane %v791_v33, 6  ;;  %v433_v59 = vmul.f32 %v2093_v39, %v425_v54  ;;  %v643_v56 = vsel %vm422_vm2, 0.0, %v635_v45 }
  0x41   : > { %v947_v60 = vsel %vm393_vm1, 0.0, %v939_v49  ;;  %v647_v63 = vmul.f32 %v643_v56, %v2093_v39  ;;  %v645_v0 = vsel %vm422_vm2, 0.0, %v637_v55  ;;  %v801_v6 = vrot.slane %v793_v57, 6 }
  0x42   : > { %v435_v62 = vadd.f32 %v431_v53, %v406_v12  ;;  %v807_v1 = vsel %vm422_vm2, 0.0, %v799_v58  ;;  %v437_v2 = vadd.f32 %v433_v59, %v408_v17  ;;  %v649_v3 = vmul.f32 %v645_v0, %v2093_v39  ;;  %v2212_v0 = vld [vmem:[%s2033_s14 + $0x20] sm:$0xff] }
  0x43   : > { %v811_v5 = vmul.f32 %v807_v1, %v2093_v39  ;;  %v651_v8 = vadd.f32 %v647_v63, %v627_v23  ;;  %v951_v9 = vmul.f32 %v947_v60, %v2088_v38  ;;  %v941_v61 = vrot.slane %v2177_v52, 7 }
  0x44   : > { %v443_v7 = vrot.slane %v435_v62, 4  ;;  %v445_v10 = vrot.slane %v437_v2, 4  ;;  %v653_v12 = vadd.f32 %v649_v3, %v629_v32  ;;  %v809_v15 = vsel %vm422_vm2, 0.0, %v801_v6 }
  0x45   : > { %v815_v14 = vadd.f32 %v811_v5, %v791_v33  ;;  %v659_v19 = vrot.slane %v651_v8, 4  ;;  %v813_v17 = vmul.f32 %v809_v15, %v2093_v39  ;;  %v955_v22 = vadd.f32 %v951_v9, %v931_v27 }
  0x46   : > { %v452_v18 = vsel %vm451_vm3, 0.0, %v443_v7  ;;  %v454_v30 = vsel %vm451_vm3, 0.0, %v445_v10  ;;  %v661_v23 = vrot.slane %v653_v12, 4  ;;  %v2204_v55 = vrot.slane %v521_v50, %v2067_v28 }
  0x47   : > { %v460_v25 = vmul.f32 %v2113_v46, %v452_v18  ;;  %v823_v34 = vrot.slane %v815_v14, 4  ;;  %v462_v44 = vmul.f32 %v2113_v46, %v454_v30  ;;  %v667_v32 = vsel %vm451_vm3, 0.0, %v659_v19  ;;  %v2225_v18 = vld [vmem:[%s2033_s14 + $0x60] sm:$0xff] }
  0x48   : > { %v817_v33 = vadd.f32 %v813_v17, %v793_v57  ;;  %v963_v45 = vrot.slane %v955_v22, 6  ;;  %v671_v53 = vmul.f32 %v667_v32, %v2113_v46  ;;  %v669_v54 = vsel %vm451_vm3, 0.0, %v661_v23 }
  0x49   : > { %v464_v49 = vadd.f32 %v460_v25, %v435_v62  ;;  %v831_v27 = vsel %vm451_vm3, 0.0, %v823_v34  ;;  %v466_v58 = vadd.f32 %v462_v44, %v437_v2  ;;  %v673_v59 = vmul.f32 %v669_v54, %v2113_v46 }
  0x4a   : > { %v825_v56 = vrot.slane %v817_v33, 4  ;;  %v835_v57 = vmul.f32 %v831_v27, %v2113_v46  ;;  %v971_v62 = vsel %vm422_vm2, 0.0, %v963_v45  ;;  %v949_v63 = vsel %vm393_vm1, 0.0, %v941_v61  ;;  %v2238_v27 = vld [vmem:[%s2033_s14 + $0x28] sm:$0xff] }
  0x4b   : > { %v517_v60 = vadd.f32 %v2147_v4, %v464_v49  ;;  %v519_v1 = vadd.f32 %v2159_v13, %v466_v58  ;;  %v675_v3 = vadd.f32 %v671_v53, %v651_v8  ;;  %v677_v50 = vadd.f32 %v673_v59, %v653_v12 }
  0x4c   : > { %v833_v2 = vsel %vm451_vm3, 0.0, %v825_v56  ;;  %v975_v7 = vmul.f32 %v971_v62, %v2093_v39  ;;  %v953_v61 = vmul.f32 %v949_v63, %v2088_v38  ;;  %v378_v13 = vmul.f32 %v2081_v36, %v2212_v0 }
  0x4d   : > { %v522_v5 = vadd.f32 1e-06, %v517_v60  ;;  %v682_v6 = vrot.slane %v517_v60, %v2163_v16  ;;  %v837_v4 = vmul.f32 %v833_v2, %v2113_v46  ;;  %v524_v9 = vadd.f32 1e-06, %v519_v1 }
  0x4e   : > { %v690_v10 = vrot.slane %v519_v1, %v2163_v16  ;;  %v839_v12 = vadd.f32 %v835_v57, %v815_v14  ;;  %v979_v15 = vadd.f32 %v975_v7, %v955_v22  ;;  %v957_v17 = vadd.f32 %v953_v61, %v2177_v52 }
  0x4f   : > { %1730 = vlog2.f32 %v522_v5  ;;  %v695_v8 = vmul.f32 %v682_v6, %v2063_v26  ;;  %v386_v25 = vrot.slane %v378_v13, 7  ;;  %v841_v23 = vadd.f32 %v837_v4, %v817_v33 }
  0x50   : > { %1732 = vlog2.f32 %v524_v9  ;;  %v697_v19 = vmul.f32 %v690_v10, %v2063_v26  ;;  %v987_v34 = vrot.slane %v979_v15, 4  ;;  %v476_v44 = vcombine.high %v2078_v35, %v2078_v35 }
  0x51   : > { %v699_v30 = vadd.f32 %v695_v8, %v675_v3  ;;  %v965_v45 = vrot.slane %v957_v17, 6  ;;  %v395_v14 = vsel %vm393_vm1, 0.0, %v386_v25  ;;  %v380_v22 = vmul.f32 %v2081_v36, %v2225_v18 }
  0x52   : > { %v701_v32 = vadd.f32 %v697_v19, %v677_v50  ;;  %v995_v54 = vsel %vm451_vm3, 0.0, %v987_v34  ;;  %v403_v52 = vmul.f32 %v2088_v38, %v395_v14  ;;  %v490_v63 = vrot.slane %v476_v44, %v2096_v40 }
  0x53   : > { %v703_v49 = vadd.f32 1e-06, %v699_v30  ;;  %v846_v53 = vrot.slane %v699_v30, %v2163_v16  ;;  %v999_v35 = vmul.f32 %v995_v54, %v2113_v46  ;;  %v973_v59 = vsel %vm422_vm2, 0.0, %v965_v45 }
  0x54   : > { %v705_v33 = vadd.f32 1e-06, %v701_v32  ;;  %v854_v58 = vrot.slane %v701_v32, %v2163_v16  ;;  %v977_v60 = vmul.f32 %v973_v59, %v2093_v39  ;;  %v407_v57 = vadd.f32 %v403_v52, %v378_v13 }
  0x55   : > { %1734 = vlog2.f32 %v703_v49  ;;  %v859_v56 = vmul.f32 %v846_v53, %v2063_v26  ;;  %v604_v1 = vmul.f32 %v2238_v27, %v2081_v36  ;;  %v388_v5 = vrot.slane %v380_v22, 7 }
  0x56   : > { %1736 = vlog2.f32 %v705_v33  ;;  %v861_v62 = vmul.f32 %v854_v58, %v2063_v26  ;;  %v981_v50 = vadd.f32 %v977_v60, %v957_v17  ;;  %v415_v2 = vrot.slane %v407_v57, 6 }
  0x57   : > { %v863_v3 = vadd.f32 %v859_v56, %v839_v12  ;;  %v2252_v6 = vrot.slane %v2055_v24, %v429_v29  ;;  %v1003_v7 = vadd.f32 %v999_v35, %v979_v15  ;;  %v500_v9 = vrot.slane %v490_v63, %v2067_v28 }
  0x58   : > { %v865_v4 = vadd.f32 %v861_v62, %v841_v23  ;;  %v989_v40 = vrot.slane %v981_v50, 4  ;;  %v424_v13 = vsel %vm422_vm2, 0.0, %v415_v2  ;;  %v612_v17 = vrot.slane %v604_v1, 7 }
  0x59   : > { %v867_v10 = vadd.f32 1e-06, %v863_v3  ;;  %v1010_v61 = vrot.slane %v863_v3, %v2163_v16  ;;  %v432_v19 = vmul.f32 %v2093_v39, %v424_v13  ;;  %v397_v29 = vsel %vm393_vm1, 0.0, %v388_v5 }
  0x5a   : > { %v869_v8 = vadd.f32 1e-06, %v865_v4  ;;  %v1018_v12 = vrot.slane %v865_v4, %v2163_v16  ;;  %v997_v24 = vsel %vm451_vm3, 0.0, %v989_v40  ;;  %v405_v45 = vmul.f32 %v2088_v38, %v397_v29 }
  0x5b   : > { %1738 = vlog2.f32 %v867_v10  ;;  %v1023_v21 = vmul.f32 %v1010_v61, %v2063_v26  ;;  %v1001_v25 = vmul.f32 %v997_v24, %v2113_v46  ;;  %v436_v23 = vadd.f32 %v432_v19, %v407_v57 }
  0x5c   : > { %v1731_v15 = vpop.eup %1730  ;;  %1740 = vlog2.f32 %v869_v8  ;;  %v1025_v30 = vmul.f32 %v1018_v12, %v2063_v26  ;;  %v492_v14 = vcombine.high %v490_v63, %v490_v63  ;;  %v620_v52 = vsel %vm393_vm1, 0.0, %v612_v17  ;;  %v2283_v8 = vld [vmem:[%s2033_s14 + $0x30] sm:$0xff] }
  0x5d   : > { %v1733_v34 = vpop.eup %1732  ;;  %v527_v44 = vmul.f32 0.6931472, %v1731_v15  ;;  %v1027_v32 = vadd.f32 %v1023_v21, %v1003_v7  ;;  %v1005_v53 = vadd.f32 %v1001_v25, %v981_v50  ;;  %v444_v54 = vrot.slane %v436_v23, 4 }
  0x5e   : > { %v531_v49 = vmul.f32 0.6931472, %v1733_v34  ;;  %v514_v35 = vmul.f32 %v500_v9, %v2063_v26  ;;  %v409_v59 = vadd.f32 %v405_v45, %v380_v22  ;;  %v624_v62 = vmul.f32 %v620_v52, %v2088_v38  ;;  %v2279_v9 = vld [vmem:[%s2033_s14 + $0x68] sm:$0xff] }
  0x5f   : > { %v538_v33 = vmul.f32 %v2204_v55, %v527_v44  ;;  %v1031_v58 = vadd.f32 1e-06, %v1027_v32  ;;  %1105 = vst.msk [vmem:[#allocation2 - $0x7] sm:$0x80] %vm1104_vm4, %v1027_v32  ;;  %1108 = vst.msk [vmem:[#allocation6 - $0x7] sm:$0x80] %vm1104_vm4, %v1027_v32  ;;  %v2271_v60 = vadd.f32 %v1025_v30, %v1005_v53  ;;  %v508_v22 = vrot.slane %v492_v14, %v2067_v28 }
  0x60   : > { %v540_v56 = vmul.f32 %v2204_v55, %v531_v49  ;;  %v453_v57 = vsel %vm451_vm3, 0.0, %v444_v54  ;;  %v417_v50 = vrot.slane %v409_v59, 6  ;;  %v628_v7 = vadd.f32 %v624_v62, %v604_v1 }
  0x61   : > { %v542_v63 = vmul.f32 1.442695, %v538_v33  ;;  %1742 = vlog2.f32 %v1031_v58  ;;  %v461_v3 = vmul.f32 %v2113_v46, %v453_v57  ;;  %v1033_v4 = vadd.f32 1e-06, %v2271_v60 }
  0x62   : > { %v1735_v2 = vpop.eup %1734  ;;  %v546_v5 = vmul.f32 1.442695, %v540_v56  ;;  %v426_v13 = vsel %vm422_vm2, 0.0, %v417_v50  ;;  %v636_v17 = vrot.slane %v628_v7, 6  ;;  %v606_v1 = vmul.f32 %v2279_v9, %v2081_v36 }
  0x63   : > { %v1737_v10 = vpop.eup %1736  ;;  %1744 = vpow2.f32 %v542_v63  ;;  %v708_v61 = vmul.f32 0.6931472, %v1735_v2  ;;  %v465_v40 = vadd.f32 %v461_v3, %v436_v23  ;;  %v434_v19 = vmul.f32 %v2093_v39, %v426_v13 }
  0x64   : > { %1746 = vpow2.f32 %v546_v5  ;;  %v712_v12 = vmul.f32 0.6931472, %v1737_v10  ;;  %v644_v15 = vsel %vm422_vm2, 0.0, %v636_v17  ;;  %v768_v25 = vmul.f32 %v2283_v8, %v2081_v36 }
  0x65   : > { %v715_v21 = vmul.f32 %v708_v61, %v2204_v55  ;;  %1748 = vlog2.f32 %v1033_v4  ;;  %v518_v28 = vadd.f32 %v514_v35, %v465_v40  ;;  %v438_v29 = vadd.f32 %v434_v19, %v409_v59  ;;  %v2297_v35 = vld [vmem:[%s2033_s14 + $0x70] sm:$0xff] }
  0x66   : > { %v717_v24 = vmul.f32 %v712_v12, %v2204_v55  ;;  %v516_v34 = vmul.f32 %v508_v22, %v2063_v26  ;;  %v648_v44 = vmul.f32 %v644_v15, %v2093_v39  ;;  %v614_v49 = vrot.slane %v606_v1, 7 }
  0x67   : > { %v719_v30 = vmul.f32 1.442695, %v715_v21  ;;  %v523_v23 = vadd.f32 1e-06, %v518_v28  ;;  %v446_v14 = vrot.slane %v438_v29, 4  ;;  %v776_v53 = vrot.slane %v768_v25, 7 }
  0x68   : > { %v1739_v32 = vpop.eup %1738  ;;  %v723_v45 = vmul.f32 1.442695, %v717_v24  ;;  %v686_v33 = vrot.slane %v518_v28, %v2163_v16  ;;  %v652_v58 = vadd.f32 %v648_v44, %v628_v7  ;;  %v622_v57 = vsel %vm393_vm1, 0.0, %v614_v49 }
  0x69   : > { %v1741_v54 = vpop.eup %1740  ;;  %1750 = vpow2.f32 %v719_v30  ;;  %v872_v52 = vmul.f32 0.6931472, %v1739_v32  ;;  %v455_v56 = vsel %vm451_vm3, 0.0, %v446_v14  ;;  %v626_v2 = vmul.f32 %v622_v57, %v2088_v38 }
  0x6a   : > { %1752 = vpow2.f32 %v723_v45  ;;  %v876_v59 = vmul.f32 0.6931472, %v1741_v54  ;;  %v463_v63 = vmul.f32 %v2113_v46, %v455_v56  ;;  %v660_v3 = vrot.slane %v652_v58, 4 }
  0x6b   : > { %v879_v62 = vmul.f32 %v872_v52, %v2204_v55  ;;  %1754 = vlog2.f32 %v523_v23  ;;  %v784_v5 = vsel %vm393_vm1, 0.0, %v776_v53  ;;  %v770_v4 = vmul.f32 %v2297_v35, %v2081_v36 }
  0x6c   : > { %v881_v50 = vmul.f32 %v876_v59, %v2204_v55  ;;  %v467_v7 = vadd.f32 %v463_v63, %v438_v29  ;;  %v668_v10 = vsel %vm451_vm3, 0.0, %v660_v3  ;;  %v788_v61 = vmul.f32 %v784_v5, %v2088_v38 }
  0x6d   : > { %v883_v22 = vmul.f32 1.442695, %v879_v62  ;;  %v672_v12 = vmul.f32 %v668_v10, %v2113_v46  ;;  %v696_v19 = vmul.f32 %v686_v33, %v2063_v26  ;;  %v630_v17 = vadd.f32 %v626_v2, %v606_v1 }
  0x6e   : > { %v1743_v40 = vpop.eup %1742  ;;  %v887_v13 = vmul.f32 1.442695, %v881_v50  ;;  %v520_v28 = vadd.f32 %v516_v34, %v467_v7  ;;  %v792_v24 = vadd.f32 %v788_v61, %v768_v25  ;;  %v778_v29 = vrot.slane %v770_v4, 7 }
  0x6f   : > { %1756 = vpow2.f32 %v883_v22  ;;  %v1036_v21 = vmul.f32 0.6931472, %v1743_v40  ;;  %v676_v30 = vadd.f32 %v672_v12, %v652_v58  ;;  %v638_v23 = vrot.slane %v630_v17, 6  ;;  %v2329_v40 = vld [vmem:[%s2033_s14 + $0x38] sm:$0xff] }
  0x70   : > { %v1745_v15 = vpop.eup %1744  ;;  %1758 = vpow2.f32 %v887_v13  ;;  %v525_v14 = vadd.f32 1e-06, %v520_v28  ;;  %v694_v49 = vrot.slane %v520_v28, %v2163_v16  ;;  %v800_v25 = vrot.slane %v792_v24, 6 }
  0x71   : > { %v1747_v44 = vpop.eup %1746  ;;  %v550_v32 = vmul.f32 %v1745_v15, %v2072_v31  ;;  %v1043_v45 = vmul.f32 %v1036_v21, %v2204_v55  ;;  %v700_v54 = vadd.f32 %v696_v19, %v676_v30  ;;  %v646_v34 = vsel %vm422_vm2, 0.0, %v638_v23 }
  0x72   : > { %v1749_v53 = vpop.eup %1748  ;;  %v552_v1 = vmul.f32 %v1747_v44, %v2084_v37  ;;  %1760 = vlog2.f32 %v525_v14  ;;  %v650_v56 = vmul.f32 %v646_v34, %v2093_v39  ;;  %v786_v57 = vsel %vm393_vm1, 0.0, %v778_v29 }
  0x73   : > { %v558_v52 = vadd.f32 %v2252_v6, %v550_v32  ;;  %v1047_v33 = vmul.f32 1.442695, %v1043_v45  ;;  %v1040_v58 = vmul.f32 0.6931472, %v1749_v53  ;;  %v704_v31 = vadd.f32 1e-06, %v700_v54 }
  0x74   : > { %v560_v59 = vadd.f32 %v2252_v6, %v552_v1  ;;  %v850_v62 = vrot.slane %v700_v54, %v2163_v16  ;;  %v808_v63 = vsel %vm422_vm2, 0.0, %v800_v25  ;;  %v654_v50 = vadd.f32 %v650_v56, %v630_v17 }
  0x75   : > { %1762 = vlog2.f32 %v558_v52  ;;  %v1045_v37 = vmul.f32 %v1040_v58, %v2204_v55  ;;  %v698_v2 = vmul.f32 %v694_v49, %v2063_v26  ;;  %v812_v5 = vmul.f32 %v808_v63, %v2093_v39 }
  0x76   : > { %v1751_v3 = vpop.eup %1750  ;;  %1764 = vlog2.f32 %v560_v59  ;;  %v790_v61 = vmul.f32 %v786_v57, %v2088_v38  ;;  %v662_v19 = vrot.slane %v654_v50, 4  ;;  %v932_v29 = vmul.f32 %v2329_v40, %v2081_v36 }
  0x77   : > { %v1753_v22 = vpop.eup %1752  ;;  %v727_v7 = vmul.f32 %v1751_v3, %v2099_v41  ;;  %1766 = vpow2.f32 %v1047_v33  ;;  %v1051_v10 = vmul.f32 1.442695, %v1045_v37  ;;  %v816_v17 = vadd.f32 %v812_v5, %v792_v24  ;;  %v2340_v24 = vld [vmem:[%s2033_s14 + $0x78] sm:$0xff]  ;;  %s1601_s14 = sshll.u32 (%p1999_p6), %s1916_s20, 5 }
  0x78   : > { %v1755_v13 = vpop.eup %1754  ;;  %v729_v12 = vmul.f32 %v1753_v22, %v2102_v42  ;;  %1768 = vlog2.f32 %v704_v31  ;;  %v794_v15 = vadd.f32 %v790_v61, %v770_v4  ;;  %v670_v30 = vsel %vm451_vm3, 0.0, %v662_v19  ;;  %s1356_s8 = scalar_lea.vmem (%p1999_p6), %s2561_s4, %s1601_s14 }
  0x79   : > { %v731_v21 = vadd.f32 %v727_v7, %v2252_v6  ;;  %1770 = vpow2.f32 %v1051_v10  ;;  %v529_v28 = vmul.f32 0.6931472, %v1755_v13  ;;  %v824_v23 = vrot.slane %v816_v17, 4 }
  0x7a   : > { %v733_v41 = vadd.f32 %v729_v12, %v2252_v6  ;;  %v674_v44 = vmul.f32 %v670_v30, %v2113_v46  ;;  %v802_v32 = vrot.slane %v794_v15, 6  ;;  %v860_v14 = vmul.f32 %v850_v62, %v2063_v26 }
  0x7b   : > { %1772 = vlog2.f32 %v731_v21  ;;  %v539_v42 = vmul.f32 %v2204_v55, %v529_v28  ;;  %v832_v4 = vsel %vm451_vm3, 0.0, %v824_v23  ;;  %v940_v49 = vrot.slane %v932_v29, 7 }
  0x7c   : > { %v1757_v45 = vpop.eup %1756  ;;  %1774 = vlog2.f32 %v733_v41  ;;  %v678_v34 = vadd.f32 %v674_v44, %v654_v50  ;;  %v836_v25 = vmul.f32 %v832_v4, %v2113_v46  ;;  %v810_v33 = vsel %vm422_vm2, 0.0, %v802_v32 }
  0x7d   : > { %v1759_v53 = vpop.eup %1758  ;;  %v891_v1 = vmul.f32 %v1757_v45, %v2105_v43  ;;  %v544_v54 = vmul.f32 1.442695, %v539_v42  ;;  %v948_v58 = vsel %vm393_vm1, 0.0, %v940_v49  ;;  %v2351_v59 = vmul.f32 %v2340_v24, %v2081_v36 }
  0x7e   : > { %v893_v52 = vmul.f32 %v1759_v53, %v2119_v48  ;;  %v702_v56 = vadd.f32 %v698_v2, %v678_v34  ;;  %v840_v57 = vadd.f32 %v836_v25, %v816_v17  ;;  %v814_v62 = vmul.f32 %v810_v33, %v2093_v39 }
  0x7f   : > { %v895_v31 = vadd.f32 %v891_v1, %v2252_v6  ;;  %1776 = vpow2.f32 %v544_v54  ;;  %v1761_v43 = vpop.eup %1760  ;;  %v952_v48 = vmul.f32 %v948_v58, %v2088_v38  ;;  %v942_v63 = vrot.slane %v2351_v59, 7 }
  0x80   : > { %v897_v37 = vadd.f32 %v893_v52, %v2252_v6  ;;  %v533_v3 = vmul.f32 0.6931472, %v1761_v43  ;;  %v706_v50 = vadd.f32 1e-06, %v702_v56  ;;  %v858_v36 = vrot.slane %v702_v56, %v2163_v16 }
  0x81   : > { %1778 = vlog2.f32 %v895_v31  ;;  %v864_v22 = vadd.f32 %v860_v14, %v840_v57  ;;  %v818_v7 = vadd.f32 %v814_v62, %v794_v15  ;;  %v956_v2 = vadd.f32 %v952_v48, %v932_v29 }
  0x82   : > { %v1763_v5 = vpop.eup %1762  ;;  %1780 = vlog2.f32 %v897_v37  ;;  %v541_v13 = vmul.f32 %v2204_v55, %v533_v3  ;;  %v862_v12 = vmul.f32 %v858_v36, %v2063_v26 }
  0x83   : > { %v1765_v10 = vpop.eup %1764  ;;  %v563_v61 = vmul.f32 0.6931472, %v1763_v5  ;;  %1782 = vlog2.f32 %v706_v50  ;;  %v868_v21 = vadd.f32 1e-06, %v864_v22  ;;  %v1014_v28 = vrot.slane %v864_v22, %v2163_v16 }
  0x84   : > { %v1767_v19 = vpop.eup %1766  ;;  %v567_v17 = vmul.f32 0.6931472, %v1765_v10  ;;  %v826_v41 = vrot.slane %v818_v7, 4  ;;  %v548_v15 = vmul.f32 1.442695, %v541_v13  ;;  %v964_v29 = vrot.slane %v956_v2, 6 }
  0x85   : > { %v1769_v30 = vpop.eup %1768  ;;  %v574_v23 = vmul.f32 %v2116_v47, %v563_v61  ;;  %v1055_v42 = vmul.f32 %v1767_v19, %v2156_v11  ;;  %1784 = vlog2.f32 %v868_v21  ;;  %v950_v50 = vsel %vm393_vm1, 0.0, %v942_v63 }
  0x86   : > { %v1771_v44 = vpop.eup %1770  ;;  %v576_v32 = vmul.f32 %v2116_v47, %v567_v17  ;;  %v710_v45 = vmul.f32 0.6931472, %v1769_v30  ;;  %v834_v4 = vsel %vm451_vm3, 0.0, %v826_v41  ;;  %1786 = vpow2.f32 %v548_v15 }
  0x87   : > { %v578_v14 = vmul.f32 1.442695, %v574_v23  ;;  %v1059_v49 = vadd.f32 %v1055_v42, %v2252_v6  ;;  %v1057_v53 = vmul.f32 %v1771_v44, %v2168_v20  ;;  %v838_v11 = vmul.f32 %v834_v4, %v2113_v46 }
  0x88   : > { %v1773_v1 = vpop.eup %1772  ;;  %v582_v54 = vmul.f32 1.442695, %v576_v32  ;;  %v716_v34 = vmul.f32 %v710_v45, %v2204_v55  ;;  %v972_v25 = vsel %vm422_vm2, 0.0, %v964_v29  ;;  %v1024_v13 = vmul.f32 %v1014_v28, %v2063_v26 }
  0x89   : > { %v1775_v52 = vpop.eup %1774  ;;  %1788 = vpow2.f32 %v578_v14  ;;  %v736_v33 = vmul.f32 0.6931472, %v1773_v1  ;;  %v1061_v58 = vadd.f32 %v1057_v53, %v2252_v6  ;;  %v976_v31 = vmul.f32 %v972_v25, %v2093_v39 }
  0x8a   : > { %1790 = vpow2.f32 %v582_v54  ;;  %v740_v56 = vmul.f32 0.6931472, %v1775_v52  ;;  %v721_v57 = vmul.f32 1.442695, %v716_v34  ;;  %v842_v20 = vadd.f32 %v838_v11, %v818_v7 }
  0x8b   : > { %v743_v43 = vmul.f32 %v736_v33, %v2116_v47  ;;  %1792 = vlog2.f32 %v1059_v49  ;;  %v980_v37 = vadd.f32 %v976_v31, %v956_v2  ;;  %v954_v2 = vmul.f32 %v950_v50, %v2088_v38 }
  0x8c   : > { %v1777_v62 = vpop.eup %1776  ;;  %v745_v48 = vmul.f32 %v740_v56, %v2116_v47  ;;  %1794 = vlog2.f32 %v1061_v58  ;;  %v2375_v3 = vadd.f32 %v862_v12, %v842_v20 }
  0x8d   : > { %v747_v36 = vmul.f32 1.442695, %v743_v43  ;;  %v551_v5 = vmul.f32 %v1777_v62, %v2212_v0  ;;  %1796 = vpow2.f32 %v721_v57  ;;  %v988_v22 = vrot.slane %v980_v37, 4 }
  0x8e   : > { %v1779_v10 = vpop.eup %1778  ;;  %v751_v61 = vmul.f32 1.442695, %v745_v48  ;;  %v870_v7 = vadd.f32 1e-06, %v2375_v3  ;;  %v958_v30 = vadd.f32 %v954_v2, %v2351_v59 }
  0x8f   : > { %v1781_v19 = vpop.eup %1780  ;;  %1798 = vpow2.f32 %v747_v36  ;;  %v900_v17 = vmul.f32 0.6931472, %v1779_v10  ;;  %v559_v12 = vadd.f32 %v2252_v6, %v551_v5  ;;  %v996_v63 = vsel %vm451_vm3, 0.0, %v988_v22 }
  0x90   : > { %v1783_v21 = vpop.eup %1782  ;;  %1800 = vpow2.f32 %v751_v61  ;;  %v904_v0 = vmul.f32 0.6931472, %v1781_v19  ;;  %v1000_v41 = vmul.f32 %v996_v63, %v2113_v46  ;;  %v966_v15 = vrot.slane %v958_v30, 6 }
  0x91   : > { %v907_v23 = vmul.f32 %v900_v17, %v2116_v47  ;;  %1802 = vlog2.f32 %v559_v12  ;;  %v714_v28 = vmul.f32 0.6931472, %v1783_v21 }
  0x92   : > { %v909_v38 = vmul.f32 %v904_v0, %v2116_v47  ;;  %1804 = vlog2.f32 %v870_v7  ;;  %v1004_v42 = vadd.f32 %v1000_v41, %v980_v37  ;;  %v1785_v29 = vpop.eup %1784  ;;  %v974_v59 = vsel %vm422_vm2, 0.0, %v966_v15 }
  0x93   : > { %v911_v44 = vmul.f32 1.442695, %v907_v23  ;;  %v718_v32 = vmul.f32 %v714_v28, %v2204_v55  ;;  %v1787_v45 = vpop.eup %1786  ;;  %v874_v14 = vmul.f32 0.6931472, %v1785_v29  ;;  %v978_v54 = vmul.f32 %v974_v59, %v2093_v39 }
  0x94   : > { %v915_v4 = vmul.f32 1.442695, %v909_v38  ;;  %v2389_v49 = vadd.f32 %v1024_v13, %v1004_v42  ;;  %v553_v53 = vmul.f32 %v1787_v45, %v2225_v18  ;;  %v1022_v39 = vrot.slane %v2375_v3, %v2163_v16 }
  0x95   : > { %1806 = vpow2.f32 %v911_v44  ;;  %v725_v1 = vmul.f32 1.442695, %v718_v32  ;;  %v880_v11 = vmul.f32 %v874_v14, %v2204_v55  ;;  %v982_v31 = vadd.f32 %v978_v54, %v958_v30 }
  0x96   : > { %v1789_v34 = vpop.eup %1788  ;;  %1808 = vpow2.f32 %v915_v4  ;;  %v1032_v25 = vadd.f32 1e-06, %v2389_v49  ;;  %v561_v58 = vadd.f32 %v2252_v6, %v553_v53  ;;  %v1096_v3 = vrot.slane %v2271_v60, 6 }
  0x97   : > { %v1791_v52 = vpop.eup %1790  ;;  %v590_v33 = vsub.f32 %v1789_v34, %v2125_v51  ;;  %1810 = vpow2.f32 %v725_v1  ;;  %v885_v57 = vmul.f32 1.442695, %v880_v11  ;;  %v990_v37 = vrot.slane %v982_v31, 4 }
  0x98   : > { %v1793_v56 = vpop.eup %1792  ;;  %v592_v18 = vsub.f32 %v1791_v52, %v2125_v51  ;;  %1812 = vlog2.f32 %v1032_v25  ;;  %v1026_v61 = vmul.f32 %v1022_v39, %v2063_v26  ;;  %v1095_v17 = vrot.slane %v2389_v49, 7 }
  0x99   : > { %v1795_v20 = vpop.eup %1794  ;;  %595 = vst.msk [vmem:[#allocation3] sm:$0xff] %vm594_vm5, %v590_v33  ;;  %v1064_v43 = vmul.f32 0.6931472, %v1793_v56  ;;  %1814 = vlog2.f32 %v561_v58  ;;  %v998_v5 = vsel %vm451_vm3, 0.0, %v990_v37 }
  0x9a   : > { %v1797_v62 = vpop.eup %1796  ;;  %597 = vst.msk [vmem:[#allocation3 + $0x40] sm:$0xff] %vm594_vm5, %v592_v18  ;;  %v1068_v48 = vmul.f32 0.6931472, %v1795_v20  ;;  %1816 = vpow2.f32 %v885_v57  ;;  %v1002_v10 = vmul.f32 %v998_v5, %v2113_v46  ;;  %v1098_v28 = vsel %vm1097_vm6, %v1096_v3, %v1095_v17 }
  0x9b   : > { %v1071_v50 = vmul.f32 %v1064_v43, %v2116_v47  ;;  %v728_v36 = vmul.f32 %v1797_v62, %v2238_v27 }
  0x9c   : > { %v1799_v22 = vpop.eup %1798  ;;  %v1073_v16 = vmul.f32 %v1068_v48, %v2116_v47  ;;  %v1006_v21 = vadd.f32 %v1002_v10, %v982_v31 }
  0x9d   : > { %v1801_v7 = vpop.eup %1800  ;;  %v755_v13 = vsub.f32 %v1799_v22, %v2125_v51  ;;  %v1075_v2 = vmul.f32 1.442695, %v1071_v50  ;;  %v732_v19 = vadd.f32 %v728_v36, %v2252_v6 }
  0x9e   : > { %v1803_v27 = vpop.eup %1802  ;;  %v757_v12 = vsub.f32 %v1801_v7, %v2125_v51  ;;  %v1079_v63 = vmul.f32 1.442695, %v1073_v16  ;;  %v1030_v41 = vadd.f32 %v1026_v61, %v1006_v21 }
  0x9f   : > { %v1805_v0 = vpop.eup %1804  ;;  %759 = vst.msk [vmem:[#allocation3 + $0x8] sm:$0xff] %vm594_vm5, %v755_v13  ;;  %1818 = vpow2.f32 %v1075_v2  ;;  %v565_v46 = vmul.f32 0.6931472, %v1803_v27 }
  0xa0   : > { %v1110_v26 = vld [vmem:[#allocation3] sm:$0xff]  ;;  %761 = vst.msk [vmem:[#allocation3 + $0x48] sm:$0xff] %vm594_vm5, %v757_v12  ;;  %1820 = vpow2.f32 %v1079_v63  ;;  %v878_v60 = vmul.f32 0.6931472, %v1805_v0  ;;  %v1034_v15 = vadd.f32 1e-06, %v1030_v41 }
  0xa1   : > { %1642 = vmatprep.mubr.msk.f32.mxu0 %vm594_vm5, %v1110_v26  ;;  %v1118_v30 = vld [vmem:[#allocation3 + $0x40] sm:$0xff]  ;;  %v575_v23 = vmul.f32 %v2116_v47, %v565_v46  ;;  %1822 = vlog2.f32 %v732_v19  ;;  %v1099_v29 = vrot.slane %v1030_v41, 5 }
  0xa2   : > { %v1807_v38 = vpop.eup %1806  ;;  %1654 = vmatprep.mubr.msk.f32.mxu1 %vm594_vm5, %v1118_v30  ;;  %v882_v42 = vmul.f32 %v878_v60, %v2204_v55  ;;  %1824 = vlog2.f32 %v1034_v15 }
  0xa3   : > { %v1809_v44 = vpop.eup %1808  ;;  %v919_v32 = vsub.f32 %v1807_v38, %v2125_v51  ;;  %v580_v45 = vmul.f32 1.442695, %v575_v23  ;;  %v1101_v59 = vsel %vm1100_vm7, %v1099_v29, %v1098_v28 }
  0xa4   : > { %v1811_v4 = vpop.eup %1810  ;;  %v921_v14 = vsub.f32 %v1809_v44, %v2125_v51  ;;  %v889_v49 = vmul.f32 1.442695, %v882_v42  ;;  %1107 = vst.msk [vmem:[#allocation2 + $0x1] sm:$0x7] %vm1106_vm8, %v1101_v59  ;;  %1109 = vst.msk [vmem:[#allocation6 + $0x1] sm:$0x7] %vm1106_vm8, %v1101_v59 }
  0xa5   : > { %v1813_v53 = vpop.eup %1812  ;;  %923 = vst.msk [vmem:[#allocation3 + $0x10] sm:$0xff] %vm594_vm5, %v919_v32  ;;  %1826 = vpow2.f32 %v580_v45  ;;  %v730_v1 = vmul.f32 %v1811_v4, %v2279_v9 }
  0xa6   : > { %v1815_v54 = vpop.eup %1814  ;;  %v1111_v34 = vld [vmem:[#allocation3 + $0x8] sm:$0xff]  ;;  %925 = vst.msk [vmem:[#allocation3 + $0x50] sm:$0xff] %vm594_vm5, %v921_v14  ;;  %1828 = vpow2.f32 %v889_v49  ;;  %v1038_v11 = vmul.f32 0.6931472, %v1813_v53 }
  0xa7   : > { %v1817_v25 = vpop.eup %1816  ;;  %1643 = vmatmul.mubr.msk.f32.vlgmr.msra.gmra.mxu0 %vm594_vm5, %v1111_v34  ;;  %v1119_v52 = vld [vmem:[#allocation3 + $0x48] sm:$0xff]  ;;  %v569_v33 = vmul.f32 0.6931472, %v1815_v54  ;;  %v734_v58 = vadd.f32 %v730_v1, %v2252_v6 }
  0xa8   : > { %1655 = vmatmul.mubr.msk.f32.vlgmr.msra.gmra.mxu1 %vm594_vm5, %v1119_v52  ;;  %v892_v31 = vmul.f32 %v1817_v25, %v2283_v8  ;;  %v1044_v9 = vmul.f32 %v1038_v11, %v2204_v55 }
  0xa9   : > { %v577_v56 = vmul.f32 %v2116_v47, %v569_v33  ;;  %1830 = vlog2.f32 %v734_v58 }
  0xaa   : > { %v896_v18 = vadd.f32 %v892_v31, %v2252_v6  ;;  %v1049_v57 = vmul.f32 1.442695, %v1044_v9 }
  0xab   : > { %v584_v39 = vmul.f32 1.442695, %v577_v56 }
  0xac   : > { %v1819_v20 = vpop.eup %1818  ;;  %v1112_v43 = vld [vmem:[#allocation3 + $0x10] sm:$0xff]  ;;  %1832 = vlog2.f32 %v896_v18 }
  0xad   : > { %v1821_v37 = vpop.eup %1820  ;;  %1645 = vmatprep.mubr.msk.f32.mxu0 %vm594_vm5, %v1112_v43  ;;  %v1120_v62 = vld [vmem:[#allocation3 + $0x50] sm:$0xff]  ;;  %v1083_v48 = vsub.f32 %v1819_v20, %v2125_v51  ;;  %1834 = vpow2.f32 %v584_v39 }
  0xae   : > { %v1823_v8 = vpop.eup %1822  ;;  %1657 = vmatprep.mubr.msk.f32.mxu1 %vm594_vm5, %v1120_v62  ;;  %v1085_v50 = vsub.f32 %v1821_v37, %v2125_v51  ;;  %1836 = vpow2.f32 %v1049_v57 }
  0xaf   : > { %1087 = vst.msk [vmem:[#allocation3 + $0x18] sm:$0xff] %vm594_vm5, %v1083_v48  ;;  %v738_v36 = vmul.f32 0.6931472, %v1823_v8  ;;  %v1825_v5 = vpop.eup %1824 }
  0xb0   : > { %1089 = vst.msk [vmem:[#allocation3 + $0x58] sm:$0xff] %vm594_vm5, %v1085_v50  ;;  %v1042_v3 = vmul.f32 0.6931472, %v1825_v5 }
  0xb1   : > { %v744_v22 = vmul.f32 %v738_v36, %v2116_v47 }
  0xb2   : > { %v1827_v16 = vpop.eup %1826  ;;  %v1046_v2 = vmul.f32 %v1042_v3, %v2204_v55 }
  0xb3   : > { %v1829_v10 = vpop.eup %1828  ;;  %v591_v61 = vsub.f32 %v1827_v16, %v2125_v51  ;;  %v749_v7 = vmul.f32 1.442695, %v744_v22 }
  0xb4   : > { %v894_v13 = vmul.f32 %v1829_v10, %v2297_v35  ;;  %v1053_v12 = vmul.f32 1.442695, %v1046_v2 }
  0xb5   : > { %596 = vst.msk [vmem:[#allocation3 + $0x20] sm:$0xff] %vm594_vm5, %v591_v61  ;;  %1838 = vpow2.f32 %v749_v7 }
  0xb6   : > { %v1831_v19 = vpop.eup %1830  ;;  %v1113_v17 = vld [vmem:[#allocation3 + $0x18] sm:$0xff]  ;;  %v898_v27 = vadd.f32 %v894_v13, %v2252_v6 }
  0xb7   : > { %1646 = vmatmul.mubr.msk.f32.gmra.mxu0 %vm594_vm5, %v1113_v17  ;;  %v1121_v63 = vld [vmem:[#allocation3 + $0x58] sm:$0xff]  ;;  %v742_v21 = vmul.f32 0.6931472, %v1831_v19 }
  0xb8   : > { %1658 = vmatmul.mubr.msk.f32.gmra.mxu1 %vm594_vm5, %v1121_v63  ;;  %1840 = vlog2.f32 %v898_v27 }
  0xb9   : > { %v1833_v0 = vpop.eup %1832  ;;  %v746_v35 = vmul.f32 %v742_v21, %v2116_v47  ;;  %1842 = vpow2.f32 %v1053_v12 }
  0xba   : > { %v1835_v55 = vpop.eup %1834  ;;  %v902_v46 = vmul.f32 0.6931472, %v1833_v0 }
  0xbb   : > { %v1837_v26 = vpop.eup %1836  ;;  %v593_v60 = vsub.f32 %v1835_v55, %v2125_v51  ;;  %v753_v41 = vmul.f32 1.442695, %v746_v35 }
  0xbc   : > { %v1114_v30 = vld [vmem:[#allocation3 + $0x20] sm:$0xff]  ;;  %v908_v23 = vmul.f32 %v902_v46, %v2116_v47  ;;  %v1056_v28 = vmul.f32 %v1837_v26, %v2329_v40 }
  0xbd   : > { %1648 = vmatprep.mubr.msk.f32.mxu0 %vm594_vm5, %v1114_v30  ;;  %598 = vst.msk [vmem:[#allocation3 + $0x60] sm:$0xff] %vm594_vm5, %v593_v60  ;;  %1844 = vpow2.f32 %v753_v41 }
  0xbe   : > { %v913_v38 = vmul.f32 1.442695, %v908_v23  ;;  %v1060_v42 = vadd.f32 %v1056_v28, %v2252_v6 }
  0xc0   : > { %1846 = vpow2.f32 %v913_v38 }
  0xc1   : > { %1848 = vlog2.f32 %v1060_v42 }
  0xc2   : > { %v1839_v15 = vpop.eup %1838 }
  0xc3   : > { %v756_v29 = vsub.f32 %v1839_v15, %v2125_v51 }
  0xc4   : > { %v1122_v44 = vld [vmem:[#allocation3 + $0x60] sm:$0xff] }
  0xc5   : > { %v1841_v32 = vpop.eup %1840  ;;  %1660 = vmatprep.mubr.msk.f32.mxu1 %vm594_vm5, %v1122_v44  ;;  %760 = vst.msk [vmem:[#allocation3 + $0x28] sm:$0xff] %vm594_vm5, %v756_v29 }
  0xc6   : > { %v1843_v40 = vpop.eup %1842  ;;  %v906_v45 = vmul.f32 0.6931472, %v1841_v32 }
  0xc7   : > { %v1058_v4 = vmul.f32 %v1843_v40, %v2340_v24 }
  0xc8   : > { %v910_v14 = vmul.f32 %v906_v45, %v2116_v47 }
  0xc9   : > { %v1062_v49 = vadd.f32 %v1058_v4, %v2252_v6 }
  0xca   : > { %v1845_v59 = vpop.eup %1844  ;;  %v917_v53 = vmul.f32 1.442695, %v910_v14 }
  0xcb   : > { %v758_v1 = vsub.f32 %v1845_v59, %v2125_v51  ;;  %1850 = vlog2.f32 %v1062_v49 }
  0xcc   : > { %v1115_v54 = vld [vmem:[#allocation3 + $0x28] sm:$0xff]  ;;  %1852 = vpow2.f32 %v917_v53 }
  0xcd   : > { %v1847_v34 = vpop.eup %1846  ;;  %1649 = vmatmul.mubr.msk.f32.gmra.mxu0 %vm594_vm5, %v1115_v54  ;;  %762 = vst.msk [vmem:[#allocation3 + $0x68] sm:$0xff] %vm594_vm5, %v758_v1 }
  0xce   : > { %v1849_v11 = vpop.eup %1848  ;;  %v920_v25 = vsub.f32 %v1847_v34, %v2125_v51 }
  0xcf   : > { %v1066_v24 = vmul.f32 0.6931472, %v1849_v11 }
  0xd0   : > { %924 = vst.msk [vmem:[#allocation3 + $0x30] sm:$0xff] %vm594_vm5, %v920_v25 }
  0xd1   : > { %v1072_v6 = vmul.f32 %v1066_v24, %v2116_v47 }
  0xd3   : > { %v1077_v52 = vmul.f32 1.442695, %v1072_v6 }
  0xd4   : > { %v1123_v33 = vld [vmem:[#allocation3 + $0x68] sm:$0xff] }
  0xd5   : > { %1661 = vmatmul.mubr.msk.f32.gmra.mxu1 %vm594_vm5, %v1123_v33  ;;  %1854 = vpow2.f32 %v1077_v52 }
  0xd7   : > { %v1116_v58 = vld [vmem:[#allocation3 + $0x30] sm:$0xff] }
  0xd8   : > { %v1851_v31 = vpop.eup %1850  ;;  %1651 = vmatprep.mubr.msk.f32.mxu0 %vm594_vm5, %v1116_v58 }
  0xd9   : > { %v1853_v9 = vpop.eup %1852  ;;  %v1070_v56 = vmul.f32 0.6931472, %v1851_v31 }
  0xda   : > { %v922_v18 = vsub.f32 %v1853_v9, %v2125_v51 }
  0xdb   : > { %v1074_v57 = vmul.f32 %v1070_v56, %v2116_v47 }
  0xdc   : > { %926 = vst.msk [vmem:[#allocation3 + $0x70] sm:$0xff] %vm594_vm5, %v922_v18 }
  0xdd   : > { %v1081_v39 = vmul.f32 1.442695, %v1074_v57 }
  0xdf   : > { %1856 = vpow2.f32 %v1081_v39 }
  0xe2   : > { %v1855_v20 = vpop.eup %1854 }
  0xe3   : > { %v1124_v43 = vld [vmem:[#allocation3 + $0x70] sm:$0xff]  ;;  %v1084_v37 = vsub.f32 %v1855_v20, %v2125_v51 }
  0xe4   : > { %1663 = vmatprep.mubr.msk.f32.mxu1 %vm594_vm5, %v1124_v43 }
  0xe5   : > { %1088 = vst.msk [vmem:[#allocation3 + $0x38] sm:$0xff] %vm594_vm5, %v1084_v37 }
  0xec   : > { %v1857_v62 = vpop.eup %1856  ;;  %v1117_v48 = vld [vmem:[#allocation3 + $0x38] sm:$0xff] }
  0xed   : > { %1652 = vmatmul.mubr.msk.f32.gmra.mxu0 %vm594_vm5, %v1117_v48  ;;  %v1086_v47 = vsub.f32 %v1857_v62, %v2125_v51 }
  0xef   : > { %1090 = vst.msk [vmem:[#allocation3 + $0x78] sm:$0xff] %vm594_vm5, %v1086_v47 }
  0xf6   : > { %v1125_v8 = vld [vmem:[#allocation3 + $0x78] sm:$0xff] }
  0xf7   : > { %1664 = vmatmul.mubr.msk.f32.gmra.mxu1 %vm594_vm5, %v1125_v8 }
 0x167   : > { %v1644_v50 = vpop.f32.mrf.mxu0 }
 0x168   : > { %1329 = vst.msk [vmem:[%s2035_s15 + $0x8] sm:$0xff] %vm1327_vm9, %v1644_v50  ;;  %v1656_v36 = vpop.f32.mrf.mxu1 }
 0x169   : > { %1337 = vst.msk [vmem:[%s2035_s15 + $0x48] sm:$0xff] %vm1327_vm9, %v1656_v36  ;;  %v1248_v5 = vpop.f32.mrf.mxu0 }
 0x16a   : > { %1328 = vst.msk [vmem:[%s2035_s15] sm:$0xff] %vm1327_vm9, %v1248_v5  ;;  %v1288_v51 = vpop.f32.mrf.mxu1 }
 0x16b   : > { %1336 = vst.msk [vmem:[%s2035_s15 + $0x40] sm:$0xff] %vm1327_vm9, %v1288_v51 }
 0x16f   : > { %v1417_v21 = vld [vmem:[%s2035_s15 + $0x8] sm:$0xff] (%p1999_p6) }
 0x170   : > { %1418 = vst [vmem:[%s1356_s8 + $0x8] sm:$0xff] (%p1999_p6), %v1417_v21  ;;  %v1433_v30 = vld [vmem:[%s2035_s15 + $0x48] sm:$0xff] (%p1999_p6) }
 0x171   : > { %v1415_v63 = vld [vmem:[%s2035_s15] sm:$0xff] (%p1999_p6)  ;;  %1434 = vst [vmem:[%s1356_s8 + $0xc8] sm:$0xff] (%p1999_p6), %v1433_v30 }
 0x172   : > { %1416 = vst [vmem:[%s1356_s8] sm:$0xff] (%p1999_p6), %v1415_v63  ;;  %v1431_v41 = vld [vmem:[%s2035_s15 + $0x40] sm:$0xff] (%p1999_p6) }
 0x173   : > { %1432 = vst [vmem:[%s1356_s8 + $0xc0] sm:$0xff] (%p1999_p6), %v1431_v41 }
 0x177   : > { %v1647_v22 = vpop.f32.mrf.mxu0 }
 0x178   : > { %1331 = vst.msk [vmem:[%s2035_s15 + $0x18] sm:$0xff] %vm1327_vm9, %v1647_v22  ;;  %v1659_v16 = vpop.f32.mrf.mxu1 }
 0x179   : > { %1339 = vst.msk [vmem:[%s2035_s15 + $0x58] sm:$0xff] %vm1327_vm9, %v1659_v16  ;;  %v1258_v3 = vpop.f32.mrf.mxu0 }
 0x17a   : > { %1330 = vst.msk [vmem:[%s2035_s15 + $0x10] sm:$0xff] %vm1327_vm9, %v1258_v3  ;;  %v1298_v10 = vpop.f32.mrf.mxu1 }
 0x17b   : > { %1338 = vst.msk [vmem:[%s2035_s15 + $0x50] sm:$0xff] %vm1327_vm9, %v1298_v10 }
 0x17f   : > { %v1421_v35 = vld [vmem:[%s2035_s15 + $0x18] sm:$0xff] (%p1999_p6) }
 0x180   : > { %1422 = vst [vmem:[%s1356_s8 + $0x18] sm:$0xff] (%p1999_p6), %v1421_v35  ;;  %v1437_v28 = vld [vmem:[%s2035_s15 + $0x58] sm:$0xff] (%p1999_p6) }
 0x181   : > { %v1419_v0 = vld [vmem:[%s2035_s15 + $0x10] sm:$0xff] (%p1999_p6)  ;;  %1438 = vst [vmem:[%s1356_s8 + $0xd8] sm:$0xff] (%p1999_p6), %v1437_v28 }
 0x182   : > { %1420 = vst [vmem:[%s1356_s8 + $0x10] sm:$0xff] (%p1999_p6), %v1419_v0  ;;  %v1435_v23 = vld [vmem:[%s2035_s15 + $0x50] sm:$0xff] (%p1999_p6) }
 0x183   : > { %1436 = vst [vmem:[%s1356_s8 + $0xd0] sm:$0xff] (%p1999_p6), %v1435_v23 }
 0x18d   : > { %v1650_v61 = vpop.f32.mrf.mxu0 }
 0x18e   : > { %1333 = vst.msk [vmem:[%s2035_s15 + $0x28] sm:$0xff] %vm1327_vm9, %v1650_v61 }
 0x18f   : > { %v1268_v7 = vpop.f32.mrf.mxu0 }
 0x190   : > { %1332 = vst.msk [vmem:[%s2035_s15 + $0x20] sm:$0xff] %vm1327_vm9, %v1268_v7 }
 0x195   : > { %v1662_v13 = vpop.f32.mrf.mxu1  ;;  %v1425_v46 = vld [vmem:[%s2035_s15 + $0x28] sm:$0xff] (%p1999_p6) }
 0x196   : > { %1341 = vst.msk [vmem:[%s2035_s15 + $0x68] sm:$0xff] %vm1327_vm9, %v1662_v13  ;;  %1426 = vst [vmem:[%s1356_s8 + $0x68] sm:$0xff] (%p1999_p6), %v1425_v46 }
 0x197   : > { %v1308_v2 = vpop.f32.mrf.mxu1  ;;  %v1423_v55 = vld [vmem:[%s2035_s15 + $0x20] sm:$0xff] (%p1999_p6) }
 0x198   : > { %1340 = vst.msk [vmem:[%s2035_s15 + $0x60] sm:$0xff] %vm1327_vm9, %v1308_v2  ;;  %1424 = vst [vmem:[%s1356_s8 + $0x60] sm:$0xff] (%p1999_p6), %v1423_v55 }
 0x19d   : > { %v1441_v42 = vld [vmem:[%s2035_s15 + $0x68] sm:$0xff] (%p1999_p6) }
 0x19e   : > { %1442 = vst [vmem:[%s1356_s8 + $0x128] sm:$0xff] (%p1999_p6), %v1441_v42 }
 0x19f   : > { %v1439_v38 = vld [vmem:[%s2035_s15 + $0x60] sm:$0xff] (%p1999_p6) }
 0x1a0   : > { %1440 = vst [vmem:[%s1356_s8 + $0x120] sm:$0xff] (%p1999_p6), %v1439_v38 }
 0x1ad   : > { %v1653_v19 = vpop.f32.mrf.mxu0 }
 0x1ae   : > { %1335 = vst.msk [vmem:[%s2035_s15 + $0x38] sm:$0xff] %vm1327_vm9, %v1653_v19 }
 0x1af   : > { %v1278_v17 = vpop.f32.mrf.mxu0 }
 0x1b0   : > { %1334 = vst.msk [vmem:[%s2035_s15 + $0x30] sm:$0xff] %vm1327_vm9, %v1278_v17 }
 0x1b5   : > { %v1429_v60 = vld [vmem:[%s2035_s15 + $0x38] sm:$0xff] (%p1999_p6) }
 0x1b6   : > { %1350 = sbr.rel (!%p1999_p6) target bundleno = 451 (0x1c3), region = 82  ;;  %1430 = vst [vmem:[%s1356_s8 + $0x78] sm:$0xff] (%p1999_p6), %v1429_v60 }
 0x1b7   : > { %v1665_v27 = vpop.f32.mrf.mxu1  ;;  %v1427_v26 = vld [vmem:[%s2035_s15 + $0x30] sm:$0xff] (%p1999_p6) }
 0x1b8   : > { %1343 = vst.msk [vmem:[%s2035_s15 + $0x78] sm:$0xff] %vm1327_vm9, %v1665_v27  ;;  %1428 = vst [vmem:[%s1356_s8 + $0x70] sm:$0xff] (%p1999_p6), %v1427_v26 }
 0x1b9   : > { %v1318_v12 = vpop.f32.mrf.mxu1 }
 0x1ba   : > { %1342 = vst.msk [vmem:[%s2035_s15 + $0x70] sm:$0xff] %vm1327_vm9, %v1318_v12 }
 0x1bf   : > { %v1445_v29 = vld [vmem:[%s2035_s15 + $0x78] sm:$0xff] }
 0x1c0   : > { %1446 = vst [vmem:[%s1356_s8 + $0x138] sm:$0xff] %v1445_v29 }
 0x1c1   : > { %v1443_v15 = vld [vmem:[%s2035_s15 + $0x70] sm:$0xff] }
 0x1c2   : > { %1444 = vst [vmem:[%s1356_s8 + $0x130] sm:$0xff] %v1443_v15 }
 0x1c3 PF: > { %s1927_s20 = smov [#allocation6]  }
 0x1c4   : > { %s1459_s28 = sshll.u32 %s1927_s20, 4  ;;  %s1460_s28 = int_to_ptr.vmem [resolvable:$true] %s1459_s28 }
 0x1c5   : > { %s1858_s9 = scalar_lea.vmem %s1460_s28, 64  ;;  %p1865_p1 = scmp.lt.s32.totalorder %s1460_s28, %s1460_s28 }
 0x1c6   : > { %p1859_p12 = scmp.ne.s32.totalorder %s1460_s28, %s1858_s9  ;;  %p1866_p2 = scmp.lt.s32.totalorder %s1858_s9, %s1858_s9 }
 0x1c8   : > { %p1860_p13 = pnand %p1859_p12, %p1990_p4  ;;  %p1867_p3 = por %p1866_p2, %p1865_p1 }
 0x1ca   : > { %p1861_p0 = pneg %p1860_p13 }
 0x1cc   : > { %p1868_p5 = pnand %p1867_p3, %p1861_p0 }
 0x1ce   : > { %1871 = shalt.err (!%p1868_p5)
}
 0x1cf   : > { %1683 = dma.vmem_to_hbm [thread:$0]  (%p1990_p4), %s1460_s28, 64, %s2562_s5, [#allocation7]  }
 0x1d0   : > { %1903 = dma.done.wait (%p1990_p4), [#allocation7], 64  }
 0x1d1   : > { %1905 = vsyncadd (%p1990_p4), [#allocation7], 4294967232 }
 0x1d2 PF: > { %s17_s22 = sadd.s32 1, %s1924_s22   ;;  %s2565_s18 = smov %s1912_s19 }
 0x1d3   : > { %p14_p6 = scmp.ge.s32.totalorder %s17_s22, 5   ;;  %s2566_s19 = smov %s2004_s29 }
 0x1d4   : > { %s2567_s20 = smov %s1920_s21  ;;  %s2568_s21 = smov %s2570_s23 }
 0x1d5   :  { %16 = sbr.rel (!%p14_p6) target bundleno = 3 (0x3), region = 164 }
 0x1da   :  { %1479 = vsyncpa [#allocation7], 1 }
 0x1db   :  { %1481 = vsyncpa [#allocation7 + $0x1], 1 }

</bundles_post_ra>
